<compile_context>
chip_gen: v5e
topology: v5e:2x2
jax: 0.10.0
libtpu: 0.0.40
codegen_flags: <defaults>
</compile_context>

<pallas_src>
import functools
import io
import math

import numpy as np
import jax
import jax.numpy as jnp
from jax import lax
from jax.experimental import pallas as pl
from jax.experimental.pallas import tpu as pltpu


_VMEM = pl.BlockSpec(memory_space=pltpu.MemorySpace.VMEM)


def _round_up(n, m):
    return ((n + m - 1) // m) * m


# ---------------------------------------------------------------------------
# Kernel 1: fused "x = clip(batch + noise, 0, 1)" + initial noise statistics.
# ---------------------------------------------------------------------------

def _init_kernel(batch_ref, noise_ref, x_ref, meansq_ref, norms_ref,
                 *, n_valid_elems):
    n = noise_ref[...]
    sq = n * n
    meansq_ref[...] = (jnp.sum(sq) * (1.0 / float(n_valid_elems))).reshape(1, 1)
    norms_ref[...] = jnp.sqrt(jnp.sum(sq, axis=1, keepdims=True))
    x_ref[...] = jnp.clip(batch_ref[...] + n, 0.0, 1.0)


# ---------------------------------------------------------------------------
# Kernel 2: one fully-fused PGD-entropy step.
#   MLP forward -> softmax entropy -> analytic input gradient
#   -> L2-normalized ascent step -> clip -> perturbation statistics.
# ---------------------------------------------------------------------------

def _pgd_step_kernel(x_ref, batch_ref, w1_ref, b1_ref, w2_ref, b2_ref,
                     x_out_ref, meansq_ref, norms_ref,
                     *, step, b_valid, k_valid, n_valid_elems):
    x = x_ref[...]                                             # (BP, D) f32
    xb = x.astype(jnp.bfloat16)

    # ---- forward (bf16 MXU inputs, f32 accumulation) ----
    h = jnp.dot(xb, w1_ref[...], preferred_element_type=jnp.float32) + b1_ref[...]
    h = jnp.maximum(h, 0.0)                                    # (BP, HID) f32
    logits = (jnp.dot(h.astype(jnp.bfloat16), w2_ref[...],
                      preferred_element_type=jnp.float32) + b2_ref[...])  # (BP, KP)

    # mask padded class columns (exp underflows to exactly 0 -> no NaNs, exact softmax)
    col = lax.broadcasted_iota(jnp.int32, logits.shape, 1)
    logits = jnp.where(col < k_valid, logits, -1e9)

    # ---- softmax entropy and its gradient wrt logits ----
    z = logits - jnp.max(logits, axis=1, keepdims=True)
    e = jnp.exp(z)
    denom = jnp.sum(e, axis=1, keepdims=True)
    p = e / denom
    logp = z - jnp.log(denom)
    ent = -jnp.sum(p * logp, axis=1, keepdims=True)
    gz = -p * (logp + ent)                                     # (BP, KP); 0 on padded cols

    # ---- backward through the MLP, contracting the ORIGINAL weights ----
    gh = lax.dot_general(gz.astype(jnp.bfloat16), w2_ref[...],      # gz @ w2^T
                         dimension_numbers=(((1,), (1,)), ((), ())),
                         preferred_element_type=jnp.float32)        # (BP, HID)
    gh = gh * (h > 0.0).astype(jnp.float32)                         # ReLU backward
    gx = lax.dot_general(gh.astype(jnp.bfloat16), w1_ref[...],      # gh @ w1^T
                         dimension_numbers=(((1,), (1,)), ((), ())),
                         preferred_element_type=jnp.float32)        # (BP, D)

    # ---- L2-normalized entropy-ascent step (only valid, non-padded rows) ----
    row = lax.broadcasted_iota(jnp.int32, (x.shape[0], 1), 0)
    row_mask = (row < b_valid).astype(jnp.float32)
    gnorm = jnp.sqrt(jnp.sum(gx * gx, axis=1, keepdims=True))
    x_new = jnp.clip(x + gx * (step / jnp.maximum(gnorm, 1e-12)) * row_mask,
                     0.0, 1.0)
    x_out_ref[...] = x_new

    # ---- perturbation statistics of (x_new - batch), fused ----
    delta = x_new - batch_ref[...]
    sq = delta * delta
    meansq_ref[...] = (jnp.sum(sq) * (1.0 / float(n_valid_elems))).reshape(1, 1)
    norms_ref[...] = jnp.sqrt(jnp.sum(sq, axis=1, keepdims=True))


# ---------------------------------------------------------------------------
# Kernel 3: final classifier forward (logits only).
# ---------------------------------------------------------------------------

def _fwd_kernel(x_ref, w1_ref, b1_ref, w2_ref, b2_ref, logits_ref):
    h = jnp.dot(x_ref[...].astype(jnp.bfloat16), w1_ref[...],
                preferred_element_type=jnp.float32) + b1_ref[...]
    h = jnp.maximum(h, 0.0)
    logits_ref[...] = (jnp.dot(h.astype(jnp.bfloat16), w2_ref[...],
                               preferred_element_type=jnp.float32) + b2_ref[...])


# ---------------------------------------------------------------------------
# pallas_call builders (all gridless single-block; everything fits VMEM at
# these sizes — w1 bf16 is 256 KiB, activations a few KiB).
# ---------------------------------------------------------------------------

def _build_calls(BP, D, HID, KP, step, b_valid, k_valid):
    init_call = pl.pallas_call(
        functools.partial(_init_kernel, n_valid_elems=b_valid * D),
        out_shape=(jax.ShapeDtypeStruct((BP, D), jnp.float32),
                   jax.ShapeDtypeStruct((1, 1), jnp.float32),
                   jax.ShapeDtypeStruct((BP, 1), jnp.float32)),
        in_specs=[_VMEM, _VMEM],
        out_specs=(_VMEM, _VMEM, _VMEM),
    )
    step_call = pl.pallas_call(
        functools.partial(_pgd_step_kernel, step=step, b_valid=b_valid,
                          k_valid=k_valid, n_valid_elems=b_valid * D),
        out_shape=(jax.ShapeDtypeStruct((BP, D), jnp.float32),
                   jax.ShapeDtypeStruct((1, 1), jnp.float32),
                   jax.ShapeDtypeStruct((BP, 1), jnp.float32)),
        in_specs=[_VMEM] * 6,
        out_specs=(_VMEM, _VMEM, _VMEM),
        input_output_aliases={0: 0},        # update x in place
    )
    fwd_call = pl.pallas_call(
        _fwd_kernel,
        out_shape=jax.ShapeDtypeStruct((BP, KP), jnp.float32),
        in_specs=[_VMEM] * 5,
        out_specs=_VMEM,
    )
    return init_call, step_call, fwd_call


# ---------------------------------------------------------------------------
# Jitted core: init + num_steps fused PGD steps (fori_loop) + final forward.
# Statistics are accumulated on-device; a single host transfer at the end.
# ---------------------------------------------------------------------------

@functools.partial(jax.jit,
                   static_argnames=("num_steps", "epsilon", "b_valid", "k_valid"))
def _intermediate_core(batch_p, noise_p, w1, b1, w2_p, b2_p,
                       *, num_steps, epsilon, b_valid, k_valid):
    BP, D = batch_p.shape
    HID = w1.shape[1]
    KP = w2_p.shape[1]
    step = float(epsilon) / float(num_steps)

    init_call, step_call, fwd_call = _build_calls(
        BP, D, HID, KP, step, b_valid, k_valid)

    x, init_ms, init_norms = init_call(batch_p, noise_p)

    def body(i, carry):
        x, ms_acc, nrm_acc = carry
        x, ms, nrm = step_call(x, batch_p, w1, b1, w2_p, b2_p)
        ms_acc = ms_acc.at[i].set(ms[0, 0])
        nrm_acc = nrm_acc.at[i].set(nrm[:, 0])
        return x, ms_acc, nrm_acc

    ms_acc0 = jnp.zeros((num_steps,), jnp.float32)
    nrm_acc0 = jnp.zeros((num_steps, BP), jnp.float32)
    x, ms_all, nrm_all = lax.fori_loop(0, num_steps, body, (x, ms_acc0, nrm_acc0))

    logits_p = fwd_call(x, w1, b1, w2_p, b2_p)
    return logits_p, init_ms, init_norms, ms_all, nrm_all


# ---------------------------------------------------------------------------
# `Intermediate.forward` equivalent (host wrapper: padding, casts, printing).
# ---------------------------------------------------------------------------

def intermediate_forward(batch, noise, params, *, num_steps, epsilon,
                         entropy_samples=1, outfile=None):
    # entropy_samples == 1: single-sample entropy gradient (noise-averaging degenerates).
    w1, b1, w2, b2 = params
    B = batch.shape[0]
    D = int(np.prod(batch.shape[1:]))
    HID = w1.shape[1]
    K = w2.shape[1]

    BP = _round_up(max(B, 8), 8)          # sublane-pad batch dim
    KP = _round_up(K, 128)                # lane-pad class dim

    batch2d = batch.reshape(B, D).astype(jnp.float32)
    noise2d = noise.reshape(B, D).astype(jnp.float32)
    batch_p = jnp.zeros((BP, D), jnp.float32).at[:B].set(batch2d)
    noise_p = jnp.zeros((BP, D), jnp.float32).at[:B].set(noise2d)

    # bf16 MXU inputs (accumulation stays f32 inside the kernels); zero-pad classes.
    w1_bf = w1.astype(jnp.bfloat16)
    w2_p = jnp.zeros((HID, KP), jnp.bfloat16).at[:, :K].set(w2.astype(jnp.bfloat16))
    b1_f = b1.reshape(1, HID).astype(jnp.float32)
    b2_p = jnp.zeros((1, KP), jnp.float32).at[:, :K].set(
        b2.reshape(1, K).astype(jnp.float32))

    logits_p, init_ms, init_norms, ms_all, nrm_all = _intermediate_core(
        batch_p, noise_p, w1_bf, b1_f, w2_p, b2_p,
        num_steps=num_steps, epsilon=float(epsilon), b_valid=B, k_valid=K)

    # Single host transfer after the whole jitted, pipelined loop.
    init_ms, init_norms, ms_all, nrm_all = jax.device_get(
        (init_ms, init_norms, ms_all, nrm_all))

    def _median_lower(v):        # torch.median returns the lower middle element
        s = np.sort(np.asarray(v))
        return float(s[(len(s) - 1) // 2])

    print('initial stddev:', math.sqrt(float(init_ms[0, 0])),
          file=outfile, flush=True)
    print('initial mean l2 norm:', float(np.mean(init_norms[:B, 0])),
          file=outfile, flush=True)
    print('initial median l2 norm:', _median_lower(init_norms[:B, 0]),
          file=outfile, flush=True)
    for i in range(num_steps):
        print('stddev after PGD step ' + str(i) + ':',
              math.sqrt(float(ms_all[i])), file=outfile, flush=True)
        print('mean l2 norm after PGD step ' + str(i) + ':',
              float(np.mean(nrm_all[i, :B])), file=outfile, flush=True)
        print('median l2 norm after PGD step ' + str(i) + ':',
              _median_lower(nrm_all[i, :B]), file=outfile, flush=True)

    return logits_p[:B, :K]


# ---------------------------------------------------------------------------
# Main
# ---------------------------------------------------------------------------

if __name__ == "__main__":
    key = jax.random.PRNGKey(0)
    kb, kn, kw1, kw2 = jax.random.split(key, 4)

    B, C, H, W = 2, 4, 16, 16           # small NCHW input
    D = C * H * W
    HID, K = 128, 10                    # synthetic base classifier dims

    batch = jax.random.uniform(kb, (B, C, H, W), jnp.float32)          # in [0,1]
    noise = 0.1 * jax.random.normal(kn, (B, C, H, W), jnp.float32)

    # deterministic synthetic classifier params
    w1 = 0.02 * jax.random.normal(kw1, (D, HID), jnp.float32)
    b1 = jnp.zeros((1, HID), jnp.float32)
    w2 = 0.02 * jax.random.normal(kw2, (HID, K), jnp.float32)
    b2 = jnp.zeros((1, K), jnp.float32)

    outfile = io.StringIO()   # stand-in for the module's `outfile`
    logits = intermediate_forward(
        batch, noise, (w1, b1, w2, b2),
        num_steps=3, epsilon=0.5, entropy_samples=1, outfile=outfile)

    logits = jax.block_until_ready(logits)
    assert logits.shape == (B, K) and logits.dtype == jnp.float32
    assert bool(jnp.all(jnp.isfinite(logits)))
    print("KERNEL_OK")
</pallas_src>

<mosaic_0001>
module attributes {stable_mosaic.version = 11 : i64} {
  func.func @_init_kernel(%arg0: memref<8x1024xf32, #tpu.memory_space<vmem>>, %arg1: memref<8x1024xf32, #tpu.memory_space<vmem>>, %arg2: memref<8x1024xf32, #tpu.memory_space<vmem>>, %arg3: memref<1x1xf32, #tpu.memory_space<vmem>>, %arg4: memref<8x1xf32, #tpu.memory_space<vmem>>) attributes {dimension_semantics = [], scalar_prefetch = 0 : i64, scratch_operands = 0 : i64, tpu.core_type = #tpu.core_type<tc>} {
    %c0 = arith.constant 0 : index
    %c0_0 = arith.constant 0 : index
    %0 = vector.load %arg1[%c0, %c0_0] : memref<8x1024xf32, #tpu.memory_space<vmem>>, vector<8x1024xf32>
    %1 = arith.mulf %0, %0 : vector<8x1024xf32>
    %2 = vector.shape_cast %1 : vector<8x1024xf32> to vector<1x8x1024xf32>
    %cst = arith.constant dense<0.000000e+00> : vector<1xf32>
    %3 = vector.multi_reduction <add>, %2, %cst [1, 2] : vector<1x8x1024xf32> to vector<1xf32>
    %4 = vector.shape_cast %3 : vector<1xf32> to vector<1x1x1xf32>
    %5 = vector.extract %4[0, 0, 0] : f32 from vector<1x1x1xf32>
    %cst_1 = arith.constant 4.8828125E-4 : f32
    %6 = arith.mulf %5, %cst_1 : f32
    %7 = vector.broadcast %6 : f32 to vector<1x1xf32>
    %c0_2 = arith.constant 0 : index
    %c0_3 = arith.constant 0 : index
    %8 = vector.load %arg3[%c0_2, %c0_3] : memref<1x1xf32, #tpu.memory_space<vmem>>, vector<1x1xf32>
    tpu.vector_store %arg3[%c0_2, %c0_3], %7 {strides = array<i32>} : memref<1x1xf32, #tpu.memory_space<vmem>>, vector<1x1xf32>,
    %cst_4 = arith.constant dense<0.000000e+00> : vector<8xf32>
    %9 = vector.multi_reduction <add>, %1, %cst_4 [1] : vector<8x1024xf32> to vector<8xf32>
    %10 = vector.shape_cast %9 : vector<8xf32> to vector<8x1xf32>
    %11 = math.sqrt %10 : vector<8x1xf32>
    %c0_5 = arith.constant 0 : index
    %c0_6 = arith.constant 0 : index
    %12 = vector.load %arg4[%c0_5, %c0_6] : memref<8x1xf32, #tpu.memory_space<vmem>>, vector<8x1xf32>
    tpu.vector_store %arg4[%c0_5, %c0_6], %11 {strides = array<i32>} : memref<8x1xf32, #tpu.memory_space<vmem>>, vector<8x1xf32>,
    %c0_7 = arith.constant 0 : index
    %c0_8 = arith.constant 0 : index
    %13 = vector.load %arg0[%c0_7, %c0_8] : memref<8x1024xf32, #tpu.memory_space<vmem>>, vector<8x1024xf32>
    %14 = arith.addf %13, %0 : vector<8x1024xf32>
    %cst_9 = arith.constant 0.000000e+00 : f32
    %cst_10 = arith.constant 1.000000e+00 : f32
    %15 = vector.broadcast %cst_9 : f32 to vector<8x1024xf32>
    %16 = arith.maximumf %15, %14 : vector<8x1024xf32>
    %17 = vector.broadcast %cst_10 : f32 to vector<8x1024xf32>
    %18 = arith.minimumf %17, %16 : vector<8x1024xf32>
    %c0_11 = arith.constant 0 : index
    %c0_12 = arith.constant 0 : index
    %19 = vector.load %arg2[%c0_11, %c0_12] : memref<8x1024xf32, #tpu.memory_space<vmem>>, vector<8x1024xf32>
    tpu.vector_store %arg2[%c0_11, %c0_12], %18 {strides = array<i32>} : memref<8x1024xf32, #tpu.memory_space<vmem>>, vector<8x1024xf32>,
    return
  }
}

module attributes {stable_mosaic.version = 11 : i64} {
  func.func @_pgd_step_kernel(%arg0: memref<8x1024xf32, #tpu.memory_space<vmem>>, %arg1: memref<8x1024xf32, #tpu.memory_space<vmem>>, %arg2: memref<1024x128xbf16, #tpu.memory_space<vmem>>, %arg3: memref<1x128xf32, #tpu.memory_space<vmem>>, %arg4: memref<128x128xbf16, #tpu.memory_space<vmem>>, %arg5: memref<1x128xf32, #tpu.memory_space<vmem>>, %arg6: memref<8x1024xf32, #tpu.memory_space<vmem>>, %arg7: memref<1x1xf32, #tpu.memory_space<vmem>>, %arg8: memref<8x1xf32, #tpu.memory_space<vmem>>) attributes {dimension_semantics = [], scalar_prefetch = 0 : i64, scratch_operands = 0 : i64, tpu.core_type = #tpu.core_type<tc>} {
    %c0 = arith.constant 0 : index
    %c0_0 = arith.constant 0 : index
    %0 = vector.load %arg0[%c0, %c0_0] : memref<8x1024xf32, #tpu.memory_space<vmem>>, vector<8x1024xf32>
    %1 = arith.truncf %0 : vector<8x1024xf32> to vector<8x1024xbf16>
    %c0_1 = arith.constant 0 : index
    %c0_2 = arith.constant 0 : index
    %2 = vector.load %arg2[%c0_1, %c0_2] : memref<1024x128xbf16, #tpu.memory_space<vmem>>, vector<1024x128xbf16>
    %cst = arith.constant dense<0.000000e+00> : vector<8x128xf32>
    %3 = tpu.matmul %1, %2, %cst {dimension_numbers = #tpu.dot_dimension_numbers<[1], [0], [0], [1], [0, 0, 1, 1], [], []>} : vector<8x1024xbf16>, vector<1024x128xbf16>, vector<8x128xf32> -> vector<8x128xf32>
    %c0_3 = arith.constant 0 : index
    %c0_4 = arith.constant 0 : index
    %4 = vector.load %arg3[%c0_3, %c0_4] : memref<1x128xf32, #tpu.memory_space<vmem>>, vector<1x128xf32>
    %5 = vector.broadcast %4 : vector<1x128xf32> to vector<8x128xf32>
    %6 = arith.addf %3, %5 : vector<8x128xf32>
    %cst_5 = arith.constant 0.000000e+00 : f32
    %7 = vector.broadcast %cst_5 : f32 to vector<8x128xf32>
    %8 = arith.maximumf %6, %7 : vector<8x128xf32>
    %9 = arith.truncf %8 : vector<8x128xf32> to vector<8x128xbf16>
    %c0_6 = arith.constant 0 : index
    %c0_7 = arith.constant 0 : index
    %10 = vector.load %arg4[%c0_6, %c0_7] : memref<128x128xbf16, #tpu.memory_space<vmem>>, vector<128x128xbf16>
    %cst_8 = arith.constant dense<0.000000e+00> : vector<8x128xf32>
    %11 = tpu.matmul %9, %10, %cst_8 {dimension_numbers = #tpu.dot_dimension_numbers<[1], [0], [0], [1], [0, 0, 1, 1], [], []>} : vector<8x128xbf16>, vector<128x128xbf16>, vector<8x128xf32> -> vector<8x128xf32>
    %c0_9 = arith.constant 0 : index
    %c0_10 = arith.constant 0 : index
    %12 = vector.load %arg5[%c0_9, %c0_10] : memref<1x128xf32, #tpu.memory_space<vmem>>, vector<1x128xf32>
    %13 = vector.broadcast %12 : vector<1x128xf32> to vector<8x128xf32>
    %14 = arith.addf %11, %13 : vector<8x128xf32>
    %15 = tpu.iota {dimensions = array<i32: 1>} : vector<8x128xi32>
    %c10_i32 = arith.constant 10 : i32
    %16 = vector.broadcast %c10_i32 : i32 to vector<8x128xi32>
    %17 = arith.cmpi slt, %15, %16 : vector<8x128xi32>
    %cst_11 = arith.constant -1.000000e+09 : f32
    %18 = vector.broadcast %cst_11 : f32 to vector<8x128xf32>
    %19 = arith.select %17, %14, %18 : vector<8x128xi1>, vector<8x128xf32>
    %cst_12 = arith.constant dense<0xFF800000> : vector<8xf32>
    %20 = vector.multi_reduction <maximumf>, %19, %cst_12 [1] : vector<8x128xf32> to vector<8xf32>
    %21 = vector.shape_cast %20 : vector<8xf32> to vector<8x1xf32>
    %22 = vector.broadcast %21 : vector<8x1xf32> to vector<8x128xf32>
    %23 = arith.subf %19, %22 : vector<8x128xf32>
    %24 = math.exp %23 : vector<8x128xf32>
    %cst_13 = arith.constant dense<0.000000e+00> : vector<8xf32>
    %25 = vector.multi_reduction <add>, %24, %cst_13 [1] : vector<8x128xf32> to vector<8xf32>
    %26 = vector.shape_cast %25 : vector<8xf32> to vector<8x1xf32>
    %27 = vector.broadcast %26 : vector<8x1xf32> to vector<8x128xf32>
    %28 = arith.divf %24, %27 : vector<8x128xf32>
    %29 = math.log %26 : vector<8x1xf32>
    %30 = vector.broadcast %29 : vector<8x1xf32> to vector<8x128xf32>
    %31 = arith.subf %23, %30 : vector<8x128xf32>
    %32 = arith.mulf %28, %31 : vector<8x128xf32>
    %cst_14 = arith.constant dense<0.000000e+00> : vector<8xf32>
    %33 = vector.multi_reduction <add>, %32, %cst_14 [1] : vector<8x128xf32> to vector<8xf32>
    %34 = vector.shape_cast %33 : vector<8xf32> to vector<8x1xf32>
    %cst_15 = arith.constant 0.000000e+00 : f32
    %35 = vector.broadcast %cst_15 : f32 to vector<8x1xf32>
    %36 = arith.subf %35, %34 : vector<8x1xf32>
    %cst_16 = arith.constant 0.000000e+00 : f32
    %37 = vector.broadcast %cst_16 : f32 to vector<8x128xf32>
    %38 = arith.subf %37, %28 : vector<8x128xf32>
    %39 = vector.broadcast %36 : vector<8x1xf32> to vector<8x128xf32>
    %40 = arith.addf %31, %39 : vector<8x128xf32>
    %41 = arith.mulf %38, %40 : vector<8x128xf32>
    %42 = arith.truncf %41 : vector<8x128xf32> to vector<8x128xbf16>
    %c0_17 = arith.constant 0 : index
    %c0_18 = arith.constant 0 : index
    %43 = vector.load %arg4[%c0_17, %c0_18] : memref<128x128xbf16, #tpu.memory_space<vmem>>, vector<128x128xbf16>
    %cst_19 = arith.constant dense<0.000000e+00> : vector<8x128xf32>
    %44 = tpu.matmul %42, %43, %cst_19 {dimension_numbers = #tpu.dot_dimension_numbers<[1], [1], [0], [0], [0, 0, 1, 0], [], []>} : vector<8x128xbf16>, vector<128x128xbf16>, vector<8x128xf32> -> vector<8x128xf32>
    %cst_20 = arith.constant 0.000000e+00 : f32
    %45 = vector.broadcast %cst_20 : f32 to vector<8x128xf32>
    %46 = arith.cmpf ogt, %8, %45 : vector<8x128xf32>
    %47 = arith.extui %46 : vector<8x128xi1> to vector<8x128xi32>
    %48 = arith.sitofp %47 : vector<8x128xi32> to vector<8x128xf32>
    %49 = arith.mulf %44, %48 : vector<8x128xf32>
    %50 = arith.truncf %49 : vector<8x128xf32> to vector<8x128xbf16>
    %c0_21 = arith.constant 0 : index
    %c0_22 = arith.constant 0 : index
    %51 = vector.load %arg2[%c0_21, %c0_22] : memref<1024x128xbf16, #tpu.memory_space<vmem>>, vector<1024x128xbf16>
    %cst_23 = arith.constant dense<0.000000e+00> : vector<8x1024xf32>
    %52 = tpu.matmul %50, %51, %cst_23 {dimension_numbers = #tpu.dot_dimension_numbers<[1], [1], [0], [0], [0, 0, 1, 0], [], []>} : vector<8x128xbf16>, vector<1024x128xbf16>, vector<8x1024xf32> -> vector<8x1024xf32>
    %53 = tpu.iota {dimensions = array<i32: 0>} : vector<8x1xi32>
    %c2_i32 = arith.constant 2 : i32
    %54 = vector.broadcast %c2_i32 : i32 to vector<8x1xi32>
    %55 = arith.cmpi slt, %53, %54 : vector<8x1xi32>
    %56 = arith.extui %55 : vector<8x1xi1> to vector<8x1xi32>
    %57 = arith.sitofp %56 : vector<8x1xi32> to vector<8x1xf32>
    %58 = arith.mulf %52, %52 : vector<8x1024xf32>
    %cst_24 = arith.constant dense<0.000000e+00> : vector<8xf32>
    %59 = vector.multi_reduction <add>, %58, %cst_24 [1] : vector<8x1024xf32> to vector<8xf32>
    %60 = vector.shape_cast %59 : vector<8xf32> to vector<8x1xf32>
    %61 = math.sqrt %60 : vector<8x1xf32>
    %cst_25 = arith.constant 9.99999996E-13 : f32
    %62 = vector.broadcast %cst_25 : f32 to vector<8x1xf32>
    %63 = arith.maximumf %61, %62 : vector<8x1xf32>
    %cst_26 = arith.constant 0.166666672 : f32
    %64 = vector.broadcast %cst_26 : f32 to vector<8x1xf32>
    %65 = arith.divf %64, %63 : vector<8x1xf32>
    %66 = vector.broadcast %65 : vector<8x1xf32> to vector<8x1024xf32>
    %67 = arith.mulf %52, %66 : vector<8x1024xf32>
    %68 = vector.broadcast %57 : vector<8x1xf32> to vector<8x1024xf32>
    %69 = arith.mulf %67, %68 : vector<8x1024xf32>
    %70 = arith.addf %0, %69 : vector<8x1024xf32>
    %cst_27 = arith.constant 0.000000e+00 : f32
    %cst_28 = arith.constant 1.000000e+00 : f32
    %71 = vector.broadcast %cst_27 : f32 to vector<8x1024xf32>
    %72 = arith.maximumf %71, %70 : vector<8x1024xf32>
    %73 = vector.broadcast %cst_28 : f32 to vector<8x1024xf32>
    %74 = arith.minimumf %73, %72 : vector<8x1024xf32>
    %c0_29 = arith.constant 0 : index
    %c0_30 = arith.constant 0 : index
    %75 = vector.load %arg6[%c0_29, %c0_30] : memref<8x1024xf32, #tpu.memory_space<vmem>>, vector<8x1024xf32>
    tpu.vector_store %arg6[%c0_29, %c0_30], %74 {strides = array<i32>} : memref<8x1024xf32, #tpu.memory_space<vmem>>, vector<8x1024xf32>,
    %c0_31 = arith.constant 0 : index
    %c0_32 = arith.constant 0 : index
    %76 = vector.load %arg1[%c0_31, %c0_32] : memref<8x1024xf32, #tpu.memory_space<vmem>>, vector<8x1024xf32>
    %77 = arith.subf %74, %76 : vector<8x1024xf32>
    %78 = arith.mulf %77, %77 : vector<8x1024xf32>
    %79 = vector.shape_cast %78 : vector<8x1024xf32> to vector<1x8x1024xf32>
    %cst_33 = arith.constant dense<0.000000e+00> : vector<1xf32>
    %80 = vector.multi_reduction <add>, %79, %cst_33 [1, 2] : vector<1x8x1024xf32> to vector<1xf32>
    %81 = vector.shape_cast %80 : vector<1xf32> to vector<1x1x1xf32>
    %82 = vector.extract %81[0, 0, 0] : f32 from vector<1x1x1xf32>
    %cst_34 = arith.constant 4.8828125E-4 : f32
    %83 = arith.mulf %82, %cst_34 : f32
    %84 = vector.broadcast %83 : f32 to vector<1x1xf32>
    %c0_35 = arith.constant 0 : index
    %c0_36 = arith.constant 0 : index
    %85 = vector.load %arg7[%c0_35, %c0_36] : memref<1x1xf32, #tpu.memory_space<vmem>>, vector<1x1xf32>
    tpu.vector_store %arg7[%c0_35, %c0_36], %84 {strides = array<i32>} : memref<1x1xf32, #tpu.memory_space<vmem>>, vector<1x1xf32>,
    %cst_37 = arith.constant dense<0.000000e+00> : vector<8xf32>
    %86 = vector.multi_reduction <add>, %78, %cst_37 [1] : vector<8x1024xf32> to vector<8xf32>
    %87 = vector.shape_cast %86 : vector<8xf32> to vector<8x1xf32>
    %88 = math.sqrt %87 : vector<8x1xf32>
    %c0_38 = arith.constant 0 : index
    %c0_39 = arith.constant 0 : index
    %89 = vector.load %arg8[%c0_38, %c0_39] : memref<8x1xf32, #tpu.memory_space<vmem>>, vector<8x1xf32>
    tpu.vector_store %arg8[%c0_38, %c0_39], %88 {strides = array<i32>} : memref<8x1xf32, #tpu.memory_space<vmem>>, vector<8x1xf32>,
    return
  }
}

module attributes {stable_mosaic.version = 11 : i64} {
  func.func @_fwd_kernel(%arg0: memref<8x1024xf32, #tpu.memory_space<vmem>>, %arg1: memref<1024x128xbf16, #tpu.memory_space<vmem>>, %arg2: memref<1x128xf32, #tpu.memory_space<vmem>>, %arg3: memref<128x128xbf16, #tpu.memory_space<vmem>>, %arg4: memref<1x128xf32, #tpu.memory_space<vmem>>, %arg5: memref<8x128xf32, #tpu.memory_space<vmem>>) attributes {dimension_semantics = [], scalar_prefetch = 0 : i64, scratch_operands = 0 : i64, tpu.core_type = #tpu.core_type<tc>} {
    %c0 = arith.constant 0 : index
    %c0_0 = arith.constant 0 : index
    %0 = vector.load %arg0[%c0, %c0_0] : memref<8x1024xf32, #tpu.memory_space<vmem>>, vector<8x1024xf32>
    %1 = arith.truncf %0 : vector<8x1024xf32> to vector<8x1024xbf16>
    %c0_1 = arith.constant 0 : index
    %c0_2 = arith.constant 0 : index
    %2 = vector.load %arg1[%c0_1, %c0_2] : memref<1024x128xbf16, #tpu.memory_space<vmem>>, vector<1024x128xbf16>
    %cst = arith.constant dense<0.000000e+00> : vector<8x128xf32>
    %3 = tpu.matmul %1, %2, %cst {dimension_numbers = #tpu.dot_dimension_numbers<[1], [0], [0], [1], [0, 0, 1, 1], [], []>} : vector<8x1024xbf16>, vector<1024x128xbf16>, vector<8x128xf32> -> vector<8x128xf32>
    %c0_3 = arith.constant 0 : index
    %c0_4 = arith.constant 0 : index
    %4 = vector.load %arg2[%c0_3, %c0_4] : memref<1x128xf32, #tpu.memory_space<vmem>>, vector<1x128xf32>
    %5 = vector.broadcast %4 : vector<1x128xf32> to vector<8x128xf32>
    %6 = arith.addf %3, %5 : vector<8x128xf32>
    %cst_5 = arith.constant 0.000000e+00 : f32
    %7 = vector.broadcast %cst_5 : f32 to vector<8x128xf32>
    %8 = arith.maximumf %6, %7 : vector<8x128xf32>
    %9 = arith.truncf %8 : vector<8x128xf32> to vector<8x128xbf16>
    %c0_6 = arith.constant 0 : index
    %c0_7 = arith.constant 0 : index
    %10 = vector.load %arg3[%c0_6, %c0_7] : memref<128x128xbf16, #tpu.memory_space<vmem>>, vector<128x128xbf16>
    %cst_8 = arith.constant dense<0.000000e+00> : vector<8x128xf32>
    %11 = tpu.matmul %9, %10, %cst_8 {dimension_numbers = #tpu.dot_dimension_numbers<[1], [0], [0], [1], [0, 0, 1, 1], [], []>} : vector<8x128xbf16>, vector<128x128xbf16>, vector<8x128xf32> -> vector<8x128xf32>
    %c0_9 = arith.constant 0 : index
    %c0_10 = arith.constant 0 : index
    %12 = vector.load %arg4[%c0_9, %c0_10] : memref<1x128xf32, #tpu.memory_space<vmem>>, vector<1x128xf32>
    %13 = vector.broadcast %12 : vector<1x128xf32> to vector<8x128xf32>
    %14 = arith.addf %11, %13 : vector<8x128xf32>
    %c0_11 = arith.constant 0 : index
    %c0_12 = arith.constant 0 : index
    %15 = vector.load %arg5[%c0_11, %c0_12] : memref<8x128xf32, #tpu.memory_space<vmem>>, vector<8x128xf32>
    tpu.vector_store %arg5[%c0_11, %c0_12], %14 {strides = array<i32>} : memref<8x128xf32, #tpu.memory_space<vmem>>, vector<8x128xf32>,
    return
  }
}

</mosaic_0001>

<bundles_post_ra>
// kernel: _intermediate_core.2
= control target key start
LH: loop header
LB: loop body
LE: loop exit
PB: predicated region body
PF: predicated region fallthrough
CT: control target
= control target key end

     0   :  { %10 = vsyncpa [#allocation3], 0  ;;  %s308_s0 = inlined_call_operand.hbm [shape: f32[8,1024], index: 0, kind: input, shape index: {}]   ;;  %s309_s1 = inlined_call_operand.hbm [shape: f32[8,1024], index: 1, kind: input, shape index: {}]   ;;  %s310_s2 = inlined_call_operand.vmem [shape: f32[8,1024], index: 2, kind: output, shape index: {0}]   ;;  %s311_s3 = inlined_call_operand.hbm [shape: f32[1,1], index: 3, kind: output, shape index: {1}]   ;;  %s312_s4 = inlined_call_operand.vmem [shape: f32[8,1], index: 4, kind: output, shape index: {2}]  }
   0x1   :  { %11 = vsyncpa [#allocation6], 0 }
   0x2   :  { %12 = vsyncpa [#allocation4], 0  ;;  %s18_s17 = sshll.u32 %s308_s0, 4  ;;  %s244_s18 = smov [#allocation2]   ;;  %s19_s17 = int_to_ptr.hbm [resolvable:$true] %s18_s17 }
   0x3   :  { %s20_s19 = sshll.u32 %s244_s18, 4  ;;  %s29_s22 = sshll.u32 %s309_s1, 4  ;;  %s21_s19 = int_to_ptr.vmem [resolvable:$true] %s20_s19  ;;  %s30_s22 = int_to_ptr.hbm [resolvable:$true] %s29_s22 }
   0x4   :  { %23 = dma.hbm_to_vmem [thread:$0]  %s19_s17, 1024, %s21_s19, [#allocation3]  }
   0x5   :  { %s245_s23 = smov [#allocation5]  }
   0x6   :  { %s31_s24 = sshll.u32 %s245_s23, 4  ;;  %s32_s24 = int_to_ptr.vmem [resolvable:$true] %s31_s24 }
   0x7   :  { %34 = dma.hbm_to_vmem [thread:$0]  %s30_s22, 1024, %s32_s24, [#allocation6]  }
   0x8   :  { %238 = dma.done.wait [#allocation3], 1024  }
   0x9   :  { %239 = vsyncadd [#allocation3], 4294966272 }
   0xa   :  { %240 = dma.done.wait [#allocation6], 1024  }
   0xb   :  { %241 = vsyncadd [#allocation6], 4294966272  ;;  %v43_v0 = vld [vmem:[#allocation5] sm:$0xff]  ;;  %v44_v1 = vld [vmem:[#allocation5 + $0x8] sm:$0xff]  ;;  %vm91_vm1 = vcmask 7168   ;;  %s246_s14 = smov [#allocation7]  }
   0xc   :  { %v45_v2 = vld [vmem:[#allocation5 + $0x10] sm:$0xff]  ;;  %v46_v3 = vld [vmem:[#allocation5 + $0x18] sm:$0xff]  ;;  %v47_v4 = vld [vmem:[#allocation5 + $0x20] sm:$0xff]  ;;  %v51_v6 = vmul.f32 %v43_v0, %v43_v0  ;;  %v52_v7 = vmul.f32 %v44_v1, %v44_v1  ;;  %s140_s15 = sshll.u32 %s246_s14, 4  ;;  %s142_s18 = sshll.u32 %s311_s3, 4  ;;  %vm77_vm3 = vcmask 0   ;;  %s141_s15 = int_to_ptr.vmem [resolvable:$true] %s140_s15  ;;  %s143_s18 = int_to_ptr.hbm [resolvable:$true] %s142_s18 }
   0xd   :  { %v48_v5 = vld [vmem:[#allocation5 + $0x28] sm:$0xff]  ;;  %v53_v8 = vmul.f32 %v45_v2, %v45_v2  ;;  %v49_v9 = vld [vmem:[#allocation5 + $0x30] sm:$0xff]  ;;  %v93_v10 = vld [vmem:[#allocation2] sm:$0xff]  ;;  %v54_v11 = vmul.f32 %v46_v3, %v46_v3  ;;  %v55_v12 = vmul.f32 %v47_v4, %v47_v4 }
   0xe   :  { %v59_v13 = vadd.f32 %v52_v7, %v51_v6  ;;  %v94_v14 = vld [vmem:[#allocation2 + $0x8] sm:$0xff]  ;;  %v95_v15 = vld [vmem:[#allocation2 + $0x10] sm:$0xff]  ;;  %v96_v16 = vld [vmem:[#allocation2 + $0x18] sm:$0xff]  ;;  %v101_v17 = vadd.f32 %v93_v10, %v43_v0  ;;  %v56_v18 = vmul.f32 %v48_v5, %v48_v5  ;;  %v57_v39 = vmul.f32 %v49_v9, %v49_v9 }
   0xf   :  { %v97_v19 = vld [vmem:[#allocation2 + $0x20] sm:$0xff]  ;;  %v98_v20 = vld [vmem:[#allocation2 + $0x28] sm:$0xff]  ;;  %v99_v21 = vld [vmem:[#allocation2 + $0x30] sm:$0xff]  ;;  %v102_v22 = vadd.f32 %v94_v14, %v44_v1  ;;  %v103_v23 = vadd.f32 %v95_v15, %v45_v2  ;;  %v104_v24 = vadd.f32 %v96_v16, %v46_v3 }
  0x10   :  { %v50_v25 = vld [vmem:[#allocation5 + $0x38] sm:$0xff]  ;;  %v60_v26 = vadd.f32 %v59_v13, %v53_v8  ;;  %v105_v28 = vadd.f32 %v97_v19, %v47_v4  ;;  %v106_v29 = vadd.f32 %v98_v20, %v48_v5  ;;  %v107_v30 = vadd.f32 %v99_v21, %v49_v9 }
  0x11   :  { %v100_v27 = vld [vmem:[#allocation2 + $0x38] sm:$0xff]  ;;  %v109_v32 = vmax.f32 %v101_v17, 0.0  ;;  %v110_v33 = vmax.f32 %v102_v22, 0.0  ;;  %v111_v34 = vmax.f32 %v103_v23, 0.0  ;;  %v112_v36 = vmax.f32 %v104_v24, 0.0 }
  0x12   :  { %v108_v31 = vadd.f32 %v100_v27, %v50_v25  ;;  %v61_v35 = vadd.f32 %v60_v26, %v54_v11  ;;  %v113_v37 = vmax.f32 %v105_v28, 0.0  ;;  %v114_v38 = vmax.f32 %v106_v29, 0.0 }
  0x13   :  { %v115_v40 = vmax.f32 %v107_v30, 0.0  ;;  %v117_v41 = vmin.f32 %v109_v32, 1.0  ;;  %v118_v42 = vmin.f32 %v110_v33, 1.0  ;;  %v119_v45 = vmin.f32 %v111_v34, 1.0 }
  0x14   :  { %v62_v43 = vadd.f32 %v61_v35, %v55_v12  ;;  %v116_v44 = vmax.f32 %v108_v31, 0.0  ;;  %v120_v46 = vmin.f32 %v112_v36, 1.0  ;;  %v121_v47 = vmin.f32 %v113_v37, 1.0 }
  0x15   :  { %125 = vst [vmem:[%s310_s2] sm:$0xff] %v117_v41  ;;  %v58_v48 = vmul.f32 %v50_v25, %v50_v25  ;;  %v122_v50 = vmin.f32 %v114_v38, 1.0  ;;  %v123_v51 = vmin.f32 %v115_v40, 1.0 }
  0x16   :  { %v63_v49 = vadd.f32 %v62_v43, %v56_v18  ;;  %126 = vst [vmem:[%s310_s2 + $0x8] sm:$0xff] %v118_v42  ;;  %v124_v53 = vmin.f32 %v116_v44, 1.0 }
  0x17   :  { %127 = vst [vmem:[%s310_s2 + $0x10] sm:$0xff] %v119_v45 }
  0x18   :  { %v64_v52 = vadd.f32 %v63_v49, %v57_v39  ;;  %128 = vst [vmem:[%s310_s2 + $0x18] sm:$0xff] %v120_v46 }
  0x19   :  { %129 = vst [vmem:[%s310_s2 + $0x20] sm:$0xff] %v121_v47 }
  0x1a   :  { %v65_v54 = vadd.f32 %v64_v52, %v58_v48  ;;  %130 = vst [vmem:[%s310_s2 + $0x28] sm:$0xff] %v122_v50 }
  0x1b   :  { %131 = vst [vmem:[%s310_s2 + $0x30] sm:$0xff] %v123_v51 }
  0x1c   :  { %66 = vadd.xlane.f32.xlu0 %v65_v54  ;;  %132 = vst [vmem:[%s310_s2 + $0x38] sm:$0xff] %v124_v53 }
  0x8f   :  { %v67_v55 = vpop.xlane.xlu0 %66 }
  0x90   :  { %164 = vrsqrt.f32 %v67_v55  ;;  %v68_v56 = vrot.slane %v67_v55, 4  ;;  %vm86_vm0 = vcmp.eq.f32.partialorder %v67_v55, inf  ;;  %v89_v5 = vand.u32 2147483648, %v67_v55 }
  0x91   :  { %vm88_vm2 = vcmp.eq.f32.partialorder %v67_v55, 0.0 }
  0x92   :  { %v69_v57 = vadd.f32 %v68_v56, %v67_v55 }
  0x94   :  { %v70_v58 = vrot.slane %v69_v57, 2 }
  0x96   :  { %v165_v59 = vpop.eup %164  ;;  %v71_v61 = vadd.f32 %v70_v58, %v69_v57 }
  0x97   :  { %v80_v60 = vmul.f32 %v165_v59, %v67_v55 }
  0x98   :  { %v72_v63 = vrot.slane %v71_v61, 1 }
  0x99   :  { %v81_v62 = vmul.f32 %v165_v59, %v80_v60 }
  0x9a   :  { %v73_v1 = vadd.f32 %v72_v63, %v71_v61 }
  0x9b   :  { %v82_v0 = vmul.f32 0.5, %v81_v62 }
  0x9c   :  { %159 = vpush %v73_v1 }
  0x9d   :  { %v83_v2 = vsub.f32 1.5, %v82_v0 }
  0x9f   :  { %v84_v3 = vmul.f32 %v165_v59, %v83_v2 }
  0xa1   :  { %v85_v4 = vmul.f32 %v84_v3, %v67_v55 }
  0xa3   :  { %v87_v6 = vsel %vm86_vm0, %v67_v55, %v85_v4 }
  0xa4   :  { %v90_v7 = vsel %vm88_vm2, %v89_v5, %v87_v6 }
  0xa5   :  { %92 = vst.msk [vmem:[%s312_s4] sm:$0xff] %vm91_vm1, %v90_v7 }
  0xcd   :  { %s160_s19 = spop %159 }
  0xce   :  { %s75_s20 = smul.f32 0.00048828125, %s160_s19 }
  0xd0   :  { %v76_v8 = vstv %s75_s20 }
  0xd1   :  { %78 = vst.msk [vmem:[#allocation7] sm:$0x1] %vm77_vm3, %v76_v8 }
  0xd2   :  { %145 = dma.vmem_to_hbm [thread:$0]  %s141_s15, 16, %s143_s18, [#allocation4]  }
  0xd3   :  { %242 = dma.done.wait [#allocation4], 16  }
  0xd4   :  { %243 = vsyncadd [#allocation4], 4294967280 }
  0xd5   :  { %156 = vsyncpa [#allocation3], 1 }
  0xd6   :  { %157 = vsyncpa [#allocation6], 1 }
  0xd7   :  { %158 = vsyncpa [#allocation4], 1 }

// kernel: _intermediate_core.3
= control target key start
LH: loop header
LB: loop body
LE: loop exit
PB: predicated region body
PF: predicated region fallthrough
CT: control target
= control target key end

     0   :  { %10 = vsyncpa [#allocation3], 0  ;;  %s1310_s0 = inlined_call_operand.vmem [shape: f32[8,1024], index: 0, kind: input, shape index: {}]   ;;  %s1311_s1 = inlined_call_operand.hbm [shape: bf16[1024,128], index: 1, kind: input, shape index: {}]   ;;  %s1312_s2 = inlined_call_operand.vmem [shape: f32[1,128], index: 2, kind: input, shape index: {}]   ;;  %s1313_s3 = inlined_call_operand.hbm [shape: bf16[128,128], index: 3, kind: input, shape index: {}]   ;;  %s1314_s4 = inlined_call_operand.vmem [shape: f32[1,128], index: 4, kind: input, shape index: {}]   ;;  %s1315_s5 = inlined_call_operand.hbm [shape: f32[8,128], index: 5, kind: output, shape index: {}]  }
   0x1   :  { %11 = vsyncpa [#allocation6], 0 }
   0x2   :  { %12 = vsyncpa [#allocation4], 0  ;;  %s19_s20 = sshll.u32 %s1311_s1, 4  ;;  %s1236_s21 = smov [#allocation2]   ;;  %s20_s20 = int_to_ptr.hbm [resolvable:$true] %s19_s20 }
   0x3   :  { %s21_s22 = sshll.u32 %s1236_s21, 4  ;;  %s34_s25 = sshll.u32 %s1313_s3, 4  ;;  %s22_s22 = int_to_ptr.vmem [resolvable:$true] %s21_s22  ;;  %s35_s25 = int_to_ptr.hbm [resolvable:$true] %s34_s25 }
   0x4   :  { %s1237_s26 = smov 64   ;;  %s1238_s27 = smov 4  }
   0x5   :  { %27 = dma.hbm_to_vmem [thread:$0]  %s20_s20, 8192, %s22_s22, [#allocation3], %s1237_s26, %s1237_s26, %s1238_s27  }
   0x6   :  { %s1239_s28 = smov [#allocation5]  }
   0x7   :  { %s36_s29 = sshll.u32 %s1239_s28, 4  ;;  %s37_s29 = int_to_ptr.vmem [resolvable:$true] %s36_s29 }
   0x8   :  { %42 = dma.hbm_to_vmem [thread:$0]  %s35_s25, 1024, %s37_s29, [#allocation6], %s1237_s26, %s1237_s26, %s1238_s27  }
   0x9   :  { %1230 = dma.done.wait [#allocation3], 8192  }
   0xa   :  { %1231 = vsyncadd [#allocation3], 4294959104 }
   0xb   :  { %1232 = dma.done.wait [#allocation6], 1024  }
   0xc   :  { %1233 = vsyncadd [#allocation6], 4294966272  ;;  %v1086_v0 = vld [vmem:[#allocation2 + $0x38] sm:$0xff]  ;;  %v1085_v4 = vld [vmem:[#allocation2 + $0x30] sm:$0xff]  ;;  %s1240_s21 = smov [#allocation7]   ;;  %s780_s25 = sshll.u32 %s1315_s5, 4  ;;  %s781_s25 = int_to_ptr.hbm [resolvable:$true] %s780_s25 }
   0xd   :  { %v1094_v1 = vld [vmem:[#allocation2 + $0x78] sm:$0xff]  ;;  %585 = vmatpush.bf16.msra.mxu0 %v1086_v0  ;;  %v1093_v5 = vld [vmem:[#allocation2 + $0x70] sm:$0xff]  ;;  %v1084_v8 = vld [vmem:[#allocation2 + $0x28] sm:$0xff]  ;;  %s778_s22 = sshll.u32 %s1240_s21, 4  ;;  %s779_s22 = int_to_ptr.vmem [resolvable:$true] %s778_s22 }
   0xe   :  { %v1102_v2 = vld [vmem:[#allocation2 + $0xb8] sm:$0xff]  ;;  %598 = vmatpush.bf16.msra.mxu1 %v1094_v1  ;;  %v1101_v6 = vld [vmem:[#allocation2 + $0xb0] sm:$0xff]  ;;  %v1092_v9 = vld [vmem:[#allocation2 + $0x68] sm:$0xff] }
   0xf   :  { %v1110_v3 = vld [vmem:[#allocation2 + $0xf8] sm:$0xff]  ;;  %611 = vmatpush.bf16.msra.mxu2 %v1102_v2  ;;  %v1109_v7 = vld [vmem:[#allocation2 + $0xf0] sm:$0xff]  ;;  %v1100_v10 = vld [vmem:[#allocation2 + $0xa8] sm:$0xff] }
  0x10   :  { %624 = vmatpush.bf16.msra.mxu3 %v1110_v3  ;;  %v1108_v11 = vld [vmem:[#allocation2 + $0xe8] sm:$0xff]  ;;  %v1083_v12 = vld [vmem:[#allocation2 + $0x20] sm:$0xff]  ;;  %v1082_v16 = vld [vmem:[#allocation2 + $0x18] sm:$0xff] }
  0x11   :  { %586 = vmatpush.bf16.msra.mxu0 %v1085_v4  ;;  %v1091_v13 = vld [vmem:[#allocation2 + $0x60] sm:$0xff]  ;;  %v1090_v17 = vld [vmem:[#allocation2 + $0x58] sm:$0xff]  ;;  %v1081_v20 = vld [vmem:[#allocation2 + $0x10] sm:$0xff] }
  0x12   :  { %599 = vmatpush.bf16.msra.mxu1 %v1093_v5  ;;  %v1099_v14 = vld [vmem:[#allocation2 + $0xa0] sm:$0xff]  ;;  %v1098_v18 = vld [vmem:[#allocation2 + $0x98] sm:$0xff]  ;;  %v1089_v21 = vld [vmem:[#allocation2 + $0x50] sm:$0xff] }
  0x13   :  { %612 = vmatpush.bf16.msra.mxu2 %v1101_v6  ;;  %v1107_v15 = vld [vmem:[#allocation2 + $0xe0] sm:$0xff]  ;;  %v1106_v19 = vld [vmem:[#allocation2 + $0xd8] sm:$0xff]  ;;  %v1097_v22 = vld [vmem:[#allocation2 + $0x90] sm:$0xff] }
  0x14   :  { %625 = vmatpush.bf16.msra.mxu3 %v1109_v7  ;;  %v1105_v23 = vld [vmem:[#allocation2 + $0xd0] sm:$0xff]  ;;  %v1080_v24 = vld [vmem:[#allocation2 + $0x8] sm:$0xff]  ;;  %v1079_v28 = vld [vmem:[#allocation2] sm:$0xff] }
  0x15   :  { %587 = vmatpush.bf16.msra.mxu0 %v1084_v8  ;;  %v1088_v25 = vld [vmem:[#allocation2 + $0x48] sm:$0xff]  ;;  %v1087_v29 = vld [vmem:[#allocation2 + $0x40] sm:$0xff]  ;;  %v1118_v32 = vld [vmem:[#allocation2 + $0x138] sm:$0xff] }
  0x16   :  { %600 = vmatpush.bf16.msra.mxu1 %v1092_v9  ;;  %v1096_v26 = vld [vmem:[#allocation2 + $0x88] sm:$0xff]  ;;  %v1095_v30 = vld [vmem:[#allocation2 + $0x80] sm:$0xff]  ;;  %v55_v33 = vld [vmem:[%s1310_s0 + $0x10] sm:$0xff] }
  0x17   :  { %613 = vmatpush.bf16.msra.mxu2 %v1100_v10  ;;  %v1104_v27 = vld [vmem:[#allocation2 + $0xc8] sm:$0xff]  ;;  %v1103_v31 = vld [vmem:[#allocation2 + $0xc0] sm:$0xff]  ;;  %v1126_v35 = vld [vmem:[#allocation2 + $0x178] sm:$0xff]  ;;  %v63_v40 = vpack.c.bf16 %v55_v33, %v55_v33 }
  0x18   :  { %626 = vmatpush.bf16.msra.mxu3 %v1108_v11  ;;  %v53_v34 = vld [vmem:[%s1310_s0] sm:$0xff]  ;;  %v56_v36 = vld [vmem:[%s1310_s0 + $0x18] sm:$0xff]  ;;  %v54_v37 = vld [vmem:[%s1310_s0 + $0x8] sm:$0xff] }
  0x19   :  { %588 = vmatpush.bf16.msra.mxu0 %v1083_v12  ;;  %v1134_v38 = vld [vmem:[#allocation2 + $0x1b8] sm:$0xff]  ;;  %v61_v41 = vpack.c.bf16 %v53_v34, %v53_v34  ;;  %v64_v42 = vpack.c.bf16 %v56_v36, %v56_v36  ;;  %v62_v43 = vpack.c.bf16 %v54_v37, %v54_v37  ;;  %v1117_v44 = vld [vmem:[#allocation2 + $0x130] sm:$0xff]  ;;  %v1116_v48 = vld [vmem:[#allocation2 + $0x128] sm:$0xff] }
  0x1a   :  { %601 = vmatpush.bf16.msra.mxu1 %v1091_v13  ;;  %v1142_v39 = vld [vmem:[#allocation2 + $0x1f8] sm:$0xff]  ;;  %v1125_v45 = vld [vmem:[#allocation2 + $0x170] sm:$0xff]  ;;  %v1124_v49 = vld [vmem:[#allocation2 + $0x168] sm:$0xff] }
  0x1b   :  { %614 = vmatpush.bf16.msra.mxu2 %v1099_v14  ;;  %v1133_v46 = vld [vmem:[#allocation2 + $0x1b0] sm:$0xff]  ;;  %v1132_v50 = vld [vmem:[#allocation2 + $0x1a8] sm:$0xff]  ;;  %v1115_v52 = vld [vmem:[#allocation2 + $0x120] sm:$0xff] }
  0x1c   :  { %627 = vmatpush.bf16.msra.mxu3 %v1107_v15  ;;  %v1141_v47 = vld [vmem:[#allocation2 + $0x1f0] sm:$0xff]  ;;  %v1140_v51 = vld [vmem:[#allocation2 + $0x1e8] sm:$0xff]  ;;  %v1123_v53 = vld [vmem:[#allocation2 + $0x160] sm:$0xff] }
  0x1d   :  { %589 = vmatpush.bf16.msra.mxu0 %v1082_v16  ;;  %v1131_v54 = vld [vmem:[#allocation2 + $0x1a0] sm:$0xff]  ;;  %v1114_v56 = vld [vmem:[#allocation2 + $0x118] sm:$0xff]  ;;  %v1113_v60 = vld [vmem:[#allocation2 + $0x110] sm:$0xff] }
  0x1e   :  { %602 = vmatpush.bf16.msra.mxu1 %v1090_v17  ;;  %v1139_v55 = vld [vmem:[#allocation2 + $0x1e0] sm:$0xff]  ;;  %v1122_v57 = vld [vmem:[#allocation2 + $0x158] sm:$0xff]  ;;  %v1121_v61 = vld [vmem:[#allocation2 + $0x150] sm:$0xff] }
  0x1f   :  { %615 = vmatpush.bf16.msra.mxu2 %v1098_v18  ;;  %v1130_v58 = vld [vmem:[#allocation2 + $0x198] sm:$0xff]  ;;  %v1129_v62 = vld [vmem:[#allocation2 + $0x190] sm:$0xff]  ;;  %v1112_v0 = vld [vmem:[#allocation2 + $0x108] sm:$0xff] }
  0x20   :  { %628 = vmatpush.bf16.msra.mxu3 %v1106_v19  ;;  %v1138_v59 = vld [vmem:[#allocation2 + $0x1d8] sm:$0xff]  ;;  %v1137_v63 = vld [vmem:[#allocation2 + $0x1d0] sm:$0xff]  ;;  %v1120_v1 = vld [vmem:[#allocation2 + $0x148] sm:$0xff] }
  0x21   :  { %590 = vmatpush.bf16.msra.mxu0 %v1081_v20  ;;  %v1128_v2 = vld [vmem:[#allocation2 + $0x188] sm:$0xff]  ;;  %v1111_v4 = vld [vmem:[#allocation2 + $0x100] sm:$0xff]  ;;  %v59_v10 = vld [vmem:[%s1310_s0 + $0x30] sm:$0xff] }
  0x22   :  { %603 = vmatpush.bf16.msra.mxu1 %v1089_v21  ;;  %v1136_v3 = vld [vmem:[#allocation2 + $0x1c8] sm:$0xff]  ;;  %v1119_v5 = vld [vmem:[#allocation2 + $0x140] sm:$0xff]  ;;  %v60_v11 = vld [vmem:[%s1310_s0 + $0x38] sm:$0xff]  ;;  %v67_v14 = vpack.c.bf16 %v59_v10, %v59_v10 }
  0x23   :  { %616 = vmatpush.bf16.msra.mxu2 %v1097_v22  ;;  %v1127_v6 = vld [vmem:[#allocation2 + $0x180] sm:$0xff]  ;;  %v58_v8 = vld [vmem:[%s1310_s0 + $0x28] sm:$0xff]  ;;  %v68_v15 = vpack.c.bf16 %v60_v11, %v60_v11  ;;  %v1150_v16 = vld [vmem:[#allocation5 + $0x38] sm:$0xff] }
  0x24   :  { %629 = vmatpush.bf16.msra.mxu3 %v1105_v23  ;;  %v57_v7 = vld [vmem:[%s1310_s0 + $0x20] sm:$0xff]  ;;  %v66_v13 = vpack.c.bf16 %v58_v8, %v58_v8  ;;  %v1149_v17 = vld [vmem:[#allocation5 + $0x30] sm:$0xff]  ;;  %v1148_v18 = vld [vmem:[#allocation5 + $0x28] sm:$0xff] }
  0x25   :  { %591 = vmatpush.bf16.msra.mxu0 %v1080_v24  ;;  %v1135_v9 = vld [vmem:[#allocation2 + $0x1c0] sm:$0xff]  ;;  %v65_v12 = vpack.c.bf16 %v57_v7, %v57_v7  ;;  %v1146_v20 = vld [vmem:[#allocation5 + $0x18] sm:$0xff]  ;;  %v1145_v22 = vld [vmem:[#allocation5 + $0x10] sm:$0xff] }
  0x26   :  { %604 = vmatpush.bf16.msra.mxu1 %v1088_v25  ;;  %v1147_v19 = vld [vmem:[#allocation5 + $0x20] sm:$0xff]  ;;  %v1144_v24 = vld [vmem:[#allocation5 + $0x8] sm:$0xff] }
  0x27   :  { %617 = vmatpush.bf16.msra.mxu2 %v1096_v26 }
  0x28   :  { %630 = vmatpush.bf16.msra.mxu3 %v1104_v27 }
  0x29   :  { %592 = vmatpush.bf16.msra.mxu0 %v1079_v28  ;;  %v1143_v28 = vld [vmem:[#allocation5] sm:$0xff] }
  0x2a   :  { %605 = vmatpush.bf16.msra.mxu1 %v1087_v29 }
  0x2b   :  { %618 = vmatpush.bf16.msra.mxu2 %v1095_v30  ;;  %v1156_v30 = vld [vmem:[%s1312_s2] ss:$0 sm:$0xff] }
  0x2c   :  { %631 = vmatpush.bf16.msra.mxu3 %v1103_v31  ;;  %593 = vmatmul.bf16.vlgmr.msra.gmra.mxu0 %v61_v41 }
  0x2d   :  { %637 = vmatpush.bf16.msrb.mxu0 %v1118_v32  ;;  %606 = vmatmul.bf16.vlgmr.msra.gmra.mxu1 %v62_v43 }
  0x2e   :  { %650 = vmatpush.bf16.msrb.mxu1 %v1126_v35  ;;  %619 = vmatmul.bf16.vlgmr.msra.gmra.mxu2 %v63_v40 }
  0x2f   :  { %663 = vmatpush.bf16.msrb.mxu2 %v1134_v38  ;;  %632 = vmatmul.bf16.vlgmr.msra.gmra.mxu3 %v64_v42 }
  0x30   :  { %676 = vmatpush.bf16.msrb.mxu3 %v1142_v39 }
  0x31   :  { %638 = vmatpush.bf16.msrb.mxu0 %v1117_v44 }
  0x32   :  { %651 = vmatpush.bf16.msrb.mxu1 %v1125_v45 }
  0x33   :  { %664 = vmatpush.bf16.msrb.mxu2 %v1133_v46 }
  0x34   :  { %677 = vmatpush.bf16.msrb.mxu3 %v1141_v47 }
  0x35   :  { %639 = vmatpush.bf16.msrb.mxu0 %v1116_v48 }
  0x36   :  { %652 = vmatpush.bf16.msrb.mxu1 %v1124_v49 }
  0x37   :  { %665 = vmatpush.bf16.msrb.mxu2 %v1132_v50 }
  0x38   :  { %678 = vmatpush.bf16.msrb.mxu3 %v1140_v51  ;;  %v1157_v51 = vld [vmem:[%s1314_s4] ss:$0 sm:$0xff] }
  0x39   :  { %640 = vmatpush.bf16.msrb.mxu0 %v1115_v52 }
  0x3a   :  { %653 = vmatpush.bf16.msrb.mxu1 %v1123_v53 }
  0x3b   :  { %666 = vmatpush.bf16.msrb.mxu2 %v1131_v54 }
  0x3c   :  { %679 = vmatpush.bf16.msrb.mxu3 %v1139_v55 }
  0x3d   :  { %641 = vmatpush.bf16.msrb.mxu0 %v1114_v56 }
  0x3e   :  { %654 = vmatpush.bf16.msrb.mxu1 %v1122_v57 }
  0x3f   :  { %667 = vmatpush.bf16.msrb.mxu2 %v1130_v58 }
  0x40   :  { %680 = vmatpush.bf16.msrb.mxu3 %v1138_v59 }
  0x41   :  { %642 = vmatpush.bf16.msrb.mxu0 %v1113_v60 }
  0x42   :  { %655 = vmatpush.bf16.msrb.mxu1 %v1121_v61 }
  0x43   :  { %668 = vmatpush.bf16.msrb.mxu2 %v1129_v62 }
  0x44   :  { %681 = vmatpush.bf16.msrb.mxu3 %v1137_v63 }
  0x45   :  { %643 = vmatpush.bf16.msrb.mxu0 %v1112_v0 }
  0x46   :  { %656 = vmatpush.bf16.msrb.mxu1 %v1120_v1 }
  0x47   :  { %669 = vmatpush.bf16.msrb.mxu2 %v1128_v2 }
  0x48   :  { %682 = vmatpush.bf16.msrb.mxu3 %v1136_v3 }
  0x49   :  { %644 = vmatpush.bf16.msrb.mxu0 %v1111_v4 }
  0x4a   :  { %657 = vmatpush.bf16.msrb.mxu1 %v1119_v5 }
  0x4b   :  { %670 = vmatpush.bf16.msrb.mxu2 %v1127_v6 }
  0x4c   :  { %683 = vmatpush.bf16.msrb.mxu3 %v1135_v9  ;;  %645 = vmatmul.bf16.vlgmr.msrb.gmra.mxu0 %v65_v12 }
  0x4d   :  { %658 = vmatmul.bf16.vlgmr.msrb.gmra.mxu1 %v66_v13  ;;  %759 = vmatpush.bf16.msra.mxu0 %v1150_v16 }
  0x4e   :  { %671 = vmatmul.bf16.vlgmr.msrb.gmra.mxu2 %v67_v14 }
  0x4f   :  { %684 = vmatmul.bf16.vlgmr.msrb.gmra.mxu3 %v68_v15 }
  0x51   :  { %760 = vmatpush.bf16.msra.mxu0 %v1149_v17 }
  0x55   :  { %761 = vmatpush.bf16.msra.mxu0 %v1148_v18 }
  0x59   :  { %762 = vmatpush.bf16.msra.mxu0 %v1147_v19 }
  0x5d   :  { %763 = vmatpush.bf16.msra.mxu0 %v1146_v20 }
  0x61   :  { %764 = vmatpush.bf16.msra.mxu0 %v1145_v22 }
  0x65   :  { %765 = vmatpush.bf16.msra.mxu0 %v1144_v24 }
  0x69   :  { %766 = vmatpush.bf16.msra.mxu0 %v1143_v28 }
  0xa9   :  { %v594_v21 = vpop.f32.mrf.mxu0 }
  0xaa   :  { %v607_v23 = vpop.f32.mrf.mxu1  ;;  %v595_v33 = vadd.f32 %v1156_v30, %v594_v21 }
  0xac   :  { %v608_v34 = vadd.f32 %v607_v23, %v595_v33 }
  0xb1   :  { %v620_v25 = vpop.f32.mrf.mxu2  ;;  %v596_v27 = vpop.f32.mrf.mxu0 }
  0xb2   :  { %v633_v26 = vpop.f32.mrf.mxu3  ;;  %v609_v29 = vpop.f32.mrf.mxu1  ;;  %v621_v35 = vadd.f32 %v620_v25, %v608_v34 }
  0xb4   :  { %v634_v36 = vadd.f32 %v633_v26, %v621_v35 }
  0xb9   :  { %v622_v31 = vpop.f32.mrf.mxu2 }
  0xba   :  { %v635_v32 = vpop.f32.mrf.mxu3 }
  0xc9   :  { %v646_v37 = vpop.f32.mrf.mxu0 }
  0xca   :  { %v659_v38 = vpop.f32.mrf.mxu1  ;;  %v647_v39 = vadd.f32 %v646_v37, %v634_v36 }
  0xcc   :  { %v660_v40 = vadd.f32 %v659_v38, %v647_v39 }
  0xd1   :  { %v672_v41 = vpop.f32.mrf.mxu2  ;;  %v648_v44 = vpop.f32.mrf.mxu0 }
  0xd2   :  { %v685_v42 = vpop.f32.mrf.mxu3  ;;  %v673_v43 = vadd.f32 %v672_v41, %v660_v40  ;;  %v661_v45 = vpop.f32.mrf.mxu1 }
  0xd4   :  { %v686_v46 = vadd.f32 %v685_v42, %v673_v43 }
  0xd6   :  { %v689_v47 = vmax.f32 %v686_v46, 0.0 }
  0xd8   :  { %v690_v48 = vpack.c.bf16 %v689_v47, %v689_v47 }
  0xd9   :  { %v674_v49 = vpop.f32.mrf.mxu2 }
  0xda   :  { %v687_v50 = vpop.f32.mrf.mxu3  ;;  %767 = vmatmul.bf16.vlgmr.msra.gmra.mxu0 %v690_v48 }
 0x157   :  { %v768_v52 = vpop.f32.mrf.mxu0 }
 0x158   :  { %v769_v53 = vadd.f32 %v1157_v51, %v768_v52 }
 0x15a   :  { %772 = vst [vmem:[#allocation7] sm:$0xff] %v769_v53 }
 0x15b   :  { %783 = dma.vmem_to_hbm [thread:$0]  %s779_s22, 128, %s781_s25, [#allocation4]  }
 0x15f   :  { %v770_v54 = vpop.f32.mrf.mxu0 }
 0x160   :  { %1234 = dma.done.wait [#allocation4], 128  }
 0x161   :  { %1235 = vsyncadd [#allocation4], 4294967168 }
 0x162   :  { %788 = vsyncpa [#allocation3], 1 }
 0x163   :  { %789 = vsyncpa [#allocation6], 1 }
 0x164   :  { %790 = vsyncpa [#allocation4], 1 }

// kernel: closed_call.18
= control target key start
LH: loop header
LB: loop body
LE: loop exit
PB: predicated region body
PF: predicated region fallthrough
CT: control target
= control target key end

     0   :  { %14 = vsyncpa [#allocation3], 0  ;;  %s2065_s0 = inlined_call_operand.vmem [shape: f32[8,1024], index: 0, kind: input, shape index: {}, may-alias: {0,6}]   ;;  %s2066_s1 = inlined_call_operand.hbm [shape: f32[8,1024], index: 1, kind: input, shape index: {}]   ;;  %s2067_s2 = inlined_call_operand.hbm [shape: bf16[1024,128], index: 2, kind: input, shape index: {}]   ;;  %s2068_s3 = inlined_call_operand.vmem [shape: f32[1,128], index: 3, kind: input, shape index: {}]   ;;  %s2069_s4 = inlined_call_operand.hbm [shape: bf16[128,128], index: 4, kind: input, shape index: {}]   ;;  %s2070_s5 = inlined_call_operand.vmem [shape: f32[1,128], index: 5, kind: input, shape index: {}]   ;;  %s2071_s6 = inlined_call_operand.vmem [shape: f32[8,1024], index: 6, kind: output, shape index: {0}, may-alias: {0,6}]   ;;  %s2072_s7 = inlined_call_operand.hbm [shape: f32[1,1], index: 7, kind: output, shape index: {1}]   ;;  %s2073_s8 = inlined_call_operand.vmem [shape: f32[8,1], index: 8, kind: output, shape index: {2}]  }
   0x1   :  { %15 = vsyncpa [#allocation6], 0  ;;  %s34_s29 = sshll.u32 %s2067_s2, 4  ;;  %s35_s29 = int_to_ptr.hbm [resolvable:$true] %s34_s29 }
   0x2   :  { %16 = vsyncpa [#allocation4], 0  ;;  %s1619_s30 = smov [#allocation5]   ;;  %s24_s12 = sshll.u32 %s2066_s1, 4  ;;  %s25_s12 = int_to_ptr.hbm [resolvable:$true] %s24_s12 }
   0x3   :  { %s36_s9 = sshll.u32 %s1619_s30, 4  ;;  %s1620_s13 = smov 64   ;;  %s37_s9 = int_to_ptr.vmem [resolvable:$true] %s36_s9 }
   0x4   :  { %s1621_s14 = smov 4   ;;  %s1622_s15 = smov [#allocation2]  }
   0x5   :  { %42 = dma.hbm_to_vmem [thread:$0]  %s35_s29, 8192, %s37_s9, [#allocation6], %s1620_s13, %s1620_s13, %s1621_s14  }
   0x6   :  { %s26_s16 = sshll.u32 %s1622_s15, 4  ;;  %s49_s19 = sshll.u32 %s2069_s4, 4  ;;  %s27_s16 = int_to_ptr.vmem [resolvable:$true] %s26_s16  ;;  %s50_s19 = int_to_ptr.hbm [resolvable:$true] %s49_s19 }
   0x7   :  { %29 = dma.hbm_to_vmem [thread:$0]  %s25_s12, 1024, %s27_s16, [#allocation3]  }
   0x8   :  { %s1623_s2 = smov [#allocation7]  }
   0x9   :  { %s51_s20 = sshll.u32 %s1623_s2, 4  ;;  %s52_s20 = int_to_ptr.vmem [resolvable:$true] %s51_s20 }
   0xa   :  { %57 = dma.hbm_to_vmem [thread:$0]  %s50_s19, 1024, %s52_s20, [#allocation6], %s1620_s13, %s1620_s13, %s1621_s14  }
   0xb   :  { %1613 = dma.done.wait [#allocation3], 1024  }
   0xc   :  { %1614 = vsyncadd [#allocation3], 4294966272 }
   0xd   :  { %1615 = dma.done.wait [#allocation6], 9216  }
   0xe   :  { %1616 = vsyncadd [#allocation6], 4294958080  ;;  %v1680_v0 = vld [vmem:[#allocation5 + $0x78] sm:$0xff]  ;;  %v1685_v2 = vld [vmem:[#allocation5 + $0x70] sm:$0xff]  ;;  %vm1104_vm13 = vcmask 7168   ;;  %s1625_s28 = smov [#allocation8]  }
   0xf   :  { %v1682_v1 = vld [vmem:[#allocation5 + $0x38] sm:$0xff]  ;;  %617 = vmatpush.bf16.msra.mxu2 %v1680_v0  ;;  %v1688_v3 = vld [vmem:[#allocation5 + $0x30] sm:$0xff]  ;;  %v1696_v6 = vld [vmem:[#allocation5 + $0x68] sm:$0xff]  ;;  %s1113_s29 = sshll.u32 %s1625_s28, 4  ;;  %s1115_s10 = sshll.u32 %s2072_s7, 4  ;;  %s1114_s29 = int_to_ptr.vmem [resolvable:$true] %s1113_s29  ;;  %s1116_s10 = int_to_ptr.hbm [resolvable:$true] %s1115_s10 }
  0x10   :  { %604 = vmatpush.bf16.msra.mxu0 %v1682_v1  ;;  %v1690_v4 = vld [vmem:[#allocation5 + $0xf8] sm:$0xff]  ;;  %v1693_v5 = vld [vmem:[#allocation5 + $0xf0] sm:$0xff]  ;;  %v1699_v7 = vld [vmem:[#allocation5 + $0x28] sm:$0xff] }
  0x11   :  { %643 = vmatpush.bf16.msra.mxu3 %v1690_v4  ;;  %v1702_v8 = vld [vmem:[#allocation5 + $0xe8] sm:$0xff]  ;;  %v1704_v9 = vld [vmem:[#allocation5 + $0x178] sm:$0xff]  ;;  %v1707_v10 = vld [vmem:[#allocation5 + $0x60] sm:$0xff] }
  0x12   :  { %v1710_v11 = vld [vmem:[#allocation5 + $0x20] sm:$0xff]  ;;  %669 = vmatpush.bf16.msra.mxu1 %v1704_v9  ;;  %v1716_v13 = vld [vmem:[#allocation5 + $0x170] sm:$0xff]  ;;  %v1719_v14 = vld [vmem:[#allocation5 + $0x58] sm:$0xff] }
  0x13   :  { %618 = vmatpush.bf16.msra.mxu2 %v1685_v2  ;;  %v1714_v12 = vld [vmem:[#allocation5 + $0xe0] sm:$0xff]  ;;  %v1722_v15 = vld [vmem:[#allocation5 + $0x18] sm:$0xff]  ;;  %v1728_v17 = vld [vmem:[#allocation5 + $0x168] sm:$0xff] }
  0x14   :  { %605 = vmatpush.bf16.msra.mxu0 %v1688_v3  ;;  %v1726_v16 = vld [vmem:[#allocation5 + $0xd8] sm:$0xff]  ;;  %v1731_v18 = vld [vmem:[#allocation5 + $0x50] sm:$0xff]  ;;  %v1740_v21 = vld [vmem:[#allocation5 + $0x160] sm:$0xff] }
  0x15   :  { %644 = vmatpush.bf16.msra.mxu3 %v1693_v5  ;;  %v1734_v19 = vld [vmem:[#allocation5 + $0x10] sm:$0xff]  ;;  %v1743_v22 = vld [vmem:[#allocation5 + $0x48] sm:$0xff]  ;;  %v1752_v25 = vld [vmem:[#allocation5 + $0x158] sm:$0xff] }
  0x16   :  { %670 = vmatpush.bf16.msra.mxu1 %v1716_v13  ;;  %v1738_v20 = vld [vmem:[#allocation5 + $0xd0] sm:$0xff]  ;;  %v1746_v23 = vld [vmem:[#allocation5 + $0x8] sm:$0xff]  ;;  %v1755_v26 = vld [vmem:[#allocation5 + $0x40] sm:$0xff] }
  0x17   :  { %619 = vmatpush.bf16.msra.mxu2 %v1696_v6  ;;  %v1750_v24 = vld [vmem:[#allocation5 + $0xc8] sm:$0xff]  ;;  %v1762_v28 = vld [vmem:[#allocation5 + $0xb8] sm:$0xff]  ;;  %v1765_v29 = vld [vmem:[#allocation5] sm:$0xff] }
  0x18   :  { %606 = vmatpush.bf16.msra.mxu0 %v1699_v7  ;;  %v1760_v27 = vld [vmem:[%s2065_s0 + $0x8] sm:$0xff]  ;;  %v1770_v30 = vld [vmem:[%s2065_s0] sm:$0xff]  ;;  %v1773_v31 = vld [vmem:[#allocation5 + $0x138] sm:$0xff] }
  0x19   :  { %645 = vmatpush.bf16.msra.mxu3 %v1702_v8  ;;  %2081 = vst [vmem:[#allocation12_spill] sm:$0xff] %v1760_v27  ;;  %v81_v32 = vpack.c.bf16 %v1760_v27, %v1760_v27  ;;  %v1778_v33 = vld [vmem:[#allocation5 + $0xc0] sm:$0xff]  ;;  %v1780_v34 = vld [vmem:[#allocation5 + $0x150] sm:$0xff]  ;;  %v1785_v35 = vld [vmem:[%s2065_s0 + $0x18] sm:$0xff]  ;;  %v80_v37 = vpack.c.bf16 %v1770_v30, %v1770_v30 }
  0x1a   :  { %671 = vmatpush.bf16.msra.mxu1 %v1728_v17  ;;  %2082 = vst [vmem:[#allocation13_spill] sm:$0xff] %v1770_v30  ;;  %v1788_v36 = vld [vmem:[#allocation5 + $0x1f8] sm:$0xff]  ;;  %v1793_v38 = vld [vmem:[#allocation5 + $0xb0] sm:$0xff]  ;;  %v83_v40 = vpack.c.bf16 %v1785_v35, %v1785_v35  ;;  %v1803_v41 = vld [vmem:[#allocation5 + $0x148] sm:$0xff] }
  0x1b   :  { %620 = vmatpush.bf16.msra.mxu2 %v1707_v10  ;;  %2083 = vst [vmem:[#allocation14_spill] sm:$0xff] %v1785_v35  ;;  %v1797_v39 = vld [vmem:[#allocation5 + $0x130] sm:$0xff]  ;;  %v1809_v43 = vld [vmem:[#allocation5 + $0xa8] sm:$0xff]  ;;  %v1815_v45 = vld [vmem:[#allocation5 + $0x140] sm:$0xff] }
  0x1c   :  { %607 = vmatpush.bf16.msra.mxu0 %v1710_v11  ;;  %v1806_v42 = vld [vmem:[#allocation5 + $0x1f0] sm:$0xff]  ;;  %v1812_v44 = vld [vmem:[#allocation5 + $0x128] sm:$0xff]  ;;  %v1821_v47 = vld [vmem:[#allocation5 + $0xa0] sm:$0xff] }
  0x1d   :  { %646 = vmatpush.bf16.msra.mxu3 %v1714_v12  ;;  %v1818_v46 = vld [vmem:[#allocation5 + $0x1e8] sm:$0xff]  ;;  %v1829_v49 = vld [vmem:[#allocation5 + $0x120] sm:$0xff]  ;;  %v1838_v52 = vld [vmem:[#allocation5 + $0x98] sm:$0xff] }
  0x1e   :  { %672 = vmatpush.bf16.msra.mxu1 %v1740_v21  ;;  %v1826_v48 = vld [vmem:[%s2065_s0 + $0x28] sm:$0xff]  ;;  %v1835_v51 = vld [vmem:[#allocation5 + $0x1e0] sm:$0xff]  ;;  %v1841_v53 = vld [vmem:[#allocation5 + $0x118] sm:$0xff] }
  0x1f   :  { %621 = vmatpush.bf16.msra.mxu2 %v1719_v14  ;;  %2084 = vst [vmem:[#allocation15_spill] sm:$0xff] %v1826_v48  ;;  %v85_v50 = vpack.c.bf16 %v1826_v48, %v1826_v48  ;;  %v1844_v54 = vld [vmem:[#allocation5 + $0x1d8] sm:$0xff]  ;;  %v1847_v55 = vld [vmem:[#allocation5 + $0x90] sm:$0xff]  ;;  %v1856_v58 = vld [vmem:[#allocation5 + $0x88] sm:$0xff] }
  0x20   :  { %608 = vmatpush.bf16.msra.mxu0 %v1722_v15  ;;  %v1850_v56 = vld [vmem:[#allocation5 + $0x110] sm:$0xff]  ;;  %v1859_v59 = vld [vmem:[#allocation5 + $0x108] sm:$0xff]  ;;  %v1865_v61 = vld [vmem:[#allocation5 + $0x80] sm:$0xff] }
  0x21   :  { %647 = vmatpush.bf16.msra.mxu3 %v1726_v16  ;;  %v1853_v57 = vld [vmem:[#allocation5 + $0x1d0] sm:$0xff]  ;;  %v1862_v60 = vld [vmem:[#allocation5 + $0x1c8] sm:$0xff]  ;;  %v1872_v63 = vld [vmem:[#allocation5 + $0x1b8] sm:$0xff] }
  0x22   :  { %673 = vmatpush.bf16.msra.mxu1 %v1752_v25  ;;  %v1870_v62 = vld [vmem:[%s2065_s0 + $0x10] sm:$0xff]  ;;  %v1890_v48 = vld [vmem:[%s2065_s0 + $0x38] sm:$0xff]  ;;  %v1904_v30 = vld [vmem:[#allocation5 + $0x1a8] sm:$0xff] }
  0x23   :  { %622 = vmatpush.bf16.msra.mxu2 %v1731_v18  ;;  %2085 = vst [vmem:[#allocation16_spill] sm:$0xff] %v1870_v62  ;;  %v1896_v27 = vld [vmem:[#allocation5 + $0x1b0] sm:$0xff] }
  0x24   :  { %609 = vmatpush.bf16.msra.mxu0 %v1734_v19  ;;  %2087 = vst [vmem:[#allocation18_spill] sm:$0xff] %v1890_v48 }
  0x25   :  { %648 = vmatpush.bf16.msra.mxu3 %v1738_v20 }
  0x26   :  { %674 = vmatpush.bf16.msra.mxu1 %v1780_v34 }
  0x27   :  { %623 = vmatpush.bf16.msra.mxu2 %v1743_v22 }
  0x28   :  { %610 = vmatpush.bf16.msra.mxu0 %v1746_v23 }
  0x29   :  { %649 = vmatpush.bf16.msra.mxu3 %v1750_v24 }
  0x2a   :  { %675 = vmatpush.bf16.msra.mxu1 %v1803_v41 }
  0x2b   :  { %624 = vmatpush.bf16.msra.mxu2 %v1755_v26 }
  0x2c   :  { %611 = vmatpush.bf16.msra.mxu0 %v1765_v29 }
  0x2d   :  { %650 = vmatpush.bf16.msra.mxu3 %v1778_v33 }
  0x2e   :  { %625 = vmatmul.bf16.vlgmr.msra.gmra.mxu2 %v81_v32  ;;  %676 = vmatpush.bf16.msra.mxu1 %v1815_v45  ;;  %v1875_v32 = vld [vmem:[#allocation5 + $0x100] sm:$0xff] }
  0x2f   :  { %630 = vmatpush.bf16.msrb.mxu2 %v1762_v28  ;;  %612 = vmatmul.bf16.vlgmr.msra.gmra.mxu0 %v80_v37  ;;  %v1880_v37 = vld [vmem:[%s2065_s0 + $0x20] sm:$0xff] }
  0x30   :  { %656 = vmatpush.bf16.msrb.mxu0 %v1773_v31  ;;  %651 = vmatmul.bf16.vlgmr.msra.gmra.mxu3 %v83_v40  ;;  %2086 = vst [vmem:[#allocation17_spill] sm:$0xff] %v1880_v37  ;;  %v82_v40 = vpack.c.bf16 %v1870_v62, %v1870_v62  ;;  %v84_v35 = vpack.c.bf16 %v1880_v37, %v1880_v37  ;;  %v1907_v37 = vld [vmem:[#allocation5 + $0x1a0] sm:$0xff] }
  0x31   :  { %695 = vmatpush.bf16.msrb.mxu3 %v1788_v36  ;;  %677 = vmatmul.bf16.vlgmr.msra.gmra.mxu1 %v85_v50  ;;  %v1885_v50 = vld [vmem:[#allocation5 + $0x1c0] sm:$0xff]  ;;  %v87_v62 = vpack.c.bf16 %v1890_v48, %v1890_v48  ;;  %v1911_v48 = vld [vmem:[#allocation5 + $0x198] sm:$0xff] }
  0x33   :  { %631 = vmatpush.bf16.msrb.mxu2 %v1793_v38 }
  0x34   :  { %657 = vmatpush.bf16.msrb.mxu0 %v1797_v39 }
  0x35   :  { %696 = vmatpush.bf16.msrb.mxu3 %v1806_v42 }
  0x37   :  { %632 = vmatpush.bf16.msrb.mxu2 %v1809_v43 }
  0x38   :  { %658 = vmatpush.bf16.msrb.mxu0 %v1812_v44 }
  0x39   :  { %697 = vmatpush.bf16.msrb.mxu3 %v1818_v46 }
  0x3b   :  { %633 = vmatpush.bf16.msrb.mxu2 %v1821_v47 }
  0x3c   :  { %659 = vmatpush.bf16.msrb.mxu0 %v1829_v49 }
  0x3d   :  { %698 = vmatpush.bf16.msrb.mxu3 %v1835_v51 }
  0x3f   :  { %634 = vmatpush.bf16.msrb.mxu2 %v1838_v52 }
  0x40   :  { %660 = vmatpush.bf16.msrb.mxu0 %v1841_v53 }
  0x41   :  { %699 = vmatpush.bf16.msrb.mxu3 %v1844_v54 }
  0x43   :  { %635 = vmatpush.bf16.msrb.mxu2 %v1847_v55 }
  0x44   :  { %661 = vmatpush.bf16.msrb.mxu0 %v1850_v56 }
  0x45   :  { %700 = vmatpush.bf16.msrb.mxu3 %v1853_v57 }
  0x47   :  { %636 = vmatpush.bf16.msrb.mxu2 %v1856_v58 }
  0x48   :  { %662 = vmatpush.bf16.msrb.mxu0 %v1859_v59 }
  0x49   :  { %701 = vmatpush.bf16.msrb.mxu3 %v1862_v60 }
  0x4b   :  { %637 = vmatpush.bf16.msrb.mxu2 %v1865_v61 }
  0x4c   :  { %663 = vmatpush.bf16.msrb.mxu0 %v1875_v32 }
  0x4d   :  { %702 = vmatpush.bf16.msrb.mxu3 %v1885_v50 }
  0x4e   :  { %638 = vmatmul.bf16.vlgmr.msrb.gmra.mxu2 %v82_v40 }
  0x4f   :  { %682 = vmatpush.bf16.msra.mxu2 %v1872_v63  ;;  %664 = vmatmul.bf16.vlgmr.msrb.gmra.mxu0 %v84_v35  ;;  %v1914_v35 = vld [vmem:[#allocation5 + $0x190] sm:$0xff] }
  0x50   :  { %703 = vmatmul.bf16.vlgmr.msrb.gmra.mxu3 %v87_v62  ;;  %v1921_v62 = vld [vmem:[#allocation5 + $0x180] sm:$0xff] }
  0x51   :  { %859 = vmatpush.bf16.xpose.msra.mxu3 %v1680_v0  ;;  %v1918_v0 = vld [vmem:[#allocation5 + $0x188] sm:$0xff] }
  0x53   :  { %683 = vmatpush.bf16.msra.mxu2 %v1896_v27 }
  0x57   :  { %684 = vmatpush.bf16.msra.mxu2 %v1904_v30 }
  0x59   :  { %860 = vmatpush.bf16.xpose.msra.mxu3 %v1685_v2  ;;  %v1926_v2 = vld [vmem:[%s2065_s0 + $0x30] sm:$0xff] }
  0x5a   :  { %v86_v40 = vpack.c.bf16 %v1926_v2, %v1926_v2 }
  0x5b   :  { %685 = vmatpush.bf16.msra.mxu2 %v1907_v37 }
  0x5f   :  { %686 = vmatpush.bf16.msra.mxu2 %v1911_v48 }
  0x61   :  { %861 = vmatpush.bf16.xpose.msra.mxu3 %v1696_v6  ;;  %v1493_v6 = vld [vmem:[#allocation7 + $0x38] sm:$0xff] }
  0x62   :  { %778 = vmatpush.bf16.msra.mxu0 %v1493_v6  ;;  %828 = vmatpush.bf16.xpose.msrb.mxu1 %v1493_v6 }
  0x63   :  { %687 = vmatpush.bf16.msra.mxu2 %v1914_v35 }
  0x67   :  { %688 = vmatpush.bf16.msra.mxu2 %v1918_v0 }
  0x69   :  { %862 = vmatpush.bf16.xpose.msra.mxu3 %v1707_v10  ;;  %v1492_v10 = vld [vmem:[#allocation7 + $0x30] sm:$0xff] }
  0x6a   :  { %779 = vmatpush.bf16.msra.mxu0 %v1492_v10  ;;  %829 = vmatpush.bf16.xpose.msrb.mxu1 %v1492_v10 }
  0x6b   :  { %689 = vmatpush.bf16.msra.mxu2 %v1921_v62 }
  0x6e   :  { %690 = vmatmul.bf16.vlgmr.msra.gmra.mxu2 %v86_v40 }
  0x6f   :  { %846 = vmatpush.bf16.xpose.msrb.mxu2 %v1682_v1 }
  0x71   :  { %863 = vmatpush.bf16.xpose.msra.mxu3 %v1719_v14  ;;  %v1491_v14 = vld [vmem:[#allocation7 + $0x28] sm:$0xff] }
  0x72   :  { %780 = vmatpush.bf16.msra.mxu0 %v1491_v14  ;;  %830 = vmatpush.bf16.xpose.msrb.mxu1 %v1491_v14 }
  0x77   :  { %847 = vmatpush.bf16.xpose.msrb.mxu2 %v1688_v3 }
  0x79   :  { %864 = vmatpush.bf16.xpose.msra.mxu3 %v1731_v18 }
  0x7f   :  { %848 = vmatpush.bf16.xpose.msrb.mxu2 %v1699_v7 }
  0x81   :  { %865 = vmatpush.bf16.xpose.msra.mxu3 %v1743_v22 }
  0x87   :  { %849 = vmatpush.bf16.xpose.msrb.mxu2 %v1710_v11 }
  0x89   :  { %866 = vmatpush.bf16.xpose.msra.mxu3 %v1755_v26  ;;  %v1486_v26 = vld [vmem:[#allocation7] sm:$0xff] }
  0x8f   :  { %850 = vmatpush.bf16.xpose.msrb.mxu2 %v1722_v15 }
  0x91   :  { %911 = vmatpush.bf16.xpose.msrb.mxu3 %v1704_v9 }
  0x97   :  { %851 = vmatpush.bf16.xpose.msrb.mxu2 %v1734_v19  ;;  %v1489_v19 = vld [vmem:[#allocation7 + $0x18] sm:$0xff] }
  0x99   :  { %912 = vmatpush.bf16.xpose.msrb.mxu3 %v1716_v13 }
  0x9f   :  { %852 = vmatpush.bf16.xpose.msrb.mxu2 %v1746_v23  ;;  %v1487_v23 = vld [vmem:[#allocation7 + $0x8] sm:$0xff] }
  0xa1   :  { %913 = vmatpush.bf16.xpose.msrb.mxu3 %v1728_v17  ;;  %v1490_v17 = vld [vmem:[#allocation7 + $0x20] sm:$0xff] }
  0xa2   :  { %781 = vmatpush.bf16.msra.mxu0 %v1490_v17  ;;  %831 = vmatpush.bf16.xpose.msrb.mxu1 %v1490_v17 }
  0xa6   :  { %782 = vmatpush.bf16.msra.mxu0 %v1489_v19 }
  0xa7   :  { %853 = vmatpush.bf16.xpose.msrb.mxu2 %v1765_v29 }
  0xa9   :  { %914 = vmatpush.bf16.xpose.msrb.mxu3 %v1740_v21  ;;  %v1488_v21 = vld [vmem:[#allocation7 + $0x10] sm:$0xff] }
  0xaa   :  { %783 = vmatpush.bf16.msra.mxu0 %v1488_v21  ;;  %832 = vmatpush.bf16.xpose.msrb.mxu1 %v1489_v19 }
  0xac   :  { %v613_v1 = vpop.f32.mrf.mxu0 }
  0xae   :  { %v678_v11 = vpop.f32.mrf.mxu1  ;;  %784 = vmatpush.bf16.msra.mxu0 %v1487_v23 }
  0xaf   :  { %898 = vmatpush.bf16.xpose.msra.mxu2 %v1773_v31 }
  0xb1   :  { %915 = vmatpush.bf16.xpose.msrb.mxu3 %v1752_v25  ;;  %v626_v3 = vpop.f32.mrf.mxu2 }
  0xb2   :  { %785 = vmatpush.bf16.msra.mxu0 %v1486_v26  ;;  %833 = vmatpush.bf16.xpose.msrb.mxu1 %v1488_v21 }
  0xb3   :  { %v652_v9 = vpop.f32.mrf.mxu3 }
  0xb4   :  { %v615_v7 = vpop.f32.mrf.mxu0 }
  0xb6   :  { %v680_v18 = vpop.f32.mrf.mxu1  ;;  %872 = vmatpush.bf16.xpose.msrb.mxu0 %v1762_v28 }
  0xb7   :  { %899 = vmatpush.bf16.xpose.msra.mxu2 %v1797_v39 }
  0xb9   :  { %916 = vmatpush.bf16.xpose.msrb.mxu3 %v1780_v34  ;;  %v628_v13 = vpop.f32.mrf.mxu2  ;;  %v1503_v34 = vld [vmem:[%s2068_s3] ss:$0 sm:$0xff] }
  0xba   :  { %v614_v39 = vadd.f32 %v1503_v34, %v613_v1  ;;  %834 = vmatpush.bf16.xpose.msrb.mxu1 %v1487_v23 }
  0xbb   :  { %v654_v15 = vpop.f32.mrf.mxu3 }
  0xbe   :  { %873 = vmatpush.bf16.xpose.msrb.mxu0 %v1793_v38 }
  0xbf   :  { %900 = vmatpush.bf16.xpose.msra.mxu2 %v1812_v44 }
  0xc1   :  { %917 = vmatpush.bf16.xpose.msrb.mxu3 %v1803_v41 }
  0xc2   :  { %835 = vmatpush.bf16.xpose.msrb.mxu1 %v1486_v26 }
  0xc6   :  { %874 = vmatpush.bf16.xpose.msrb.mxu0 %v1809_v43 }
  0xc7   :  { %901 = vmatpush.bf16.xpose.msra.mxu2 %v1829_v49 }
  0xc9   :  { %918 = vmatpush.bf16.xpose.msrb.mxu3 %v1815_v45  ;;  %v627_v45 = vadd.f32 %v626_v3, %v614_v39 }
  0xca   :  { %885 = vmatpush.bf16.xpose.msra.mxu1 %v1690_v4  ;;  %v791_v4 = vlaneseq }
  0xcc   :  { %v665_v22 = vpop.f32.mrf.mxu0 }
  0xce   :  { %875 = vmatpush.bf16.xpose.msrb.mxu0 %v1821_v47 }
  0xcf   :  { %902 = vmatpush.bf16.xpose.msra.mxu2 %v1841_v53 }
  0xd1   :  { %v639_v25 = vpop.f32.mrf.mxu2 }
  0xd2   :  { %v640_v49 = vadd.f32 %v639_v25, %v627_v45  ;;  %886 = vmatpush.bf16.xpose.msra.mxu1 %v1693_v5  ;;  %v792_v5 = vand.u32 127, %v791_v4 }
  0xd3   :  { %v704_v29 = vpop.f32.mrf.mxu3 }
  0xd4   :  { %v667_v31 = vpop.f32.mrf.mxu0  ;;  %v653_v53 = vadd.f32 %v652_v9, %v640_v49  ;;  %vm793_vm0 = vcmp.lt.s32.totalorder %v792_v5, 10 }
  0xd6   :  { %876 = vmatpush.bf16.xpose.msrb.mxu0 %v1838_v52 }
  0xd7   :  { %903 = vmatpush.bf16.xpose.msra.mxu2 %v1850_v56  ;;  %v666_v56 = vadd.f32 %v665_v22, %v653_v53  ;;  %v1624_v22 = vmov 0.0  }
  0xd9   :  { %v641_v41 = vpop.f32.mrf.mxu2 }
  0xda   :  { %887 = vmatpush.bf16.xpose.msra.mxu1 %v1702_v8  ;;  %v1504_v8 = vld [vmem:[%s2070_s5] ss:$0 sm:$0xff] }
  0xdb   :  { %v706_v44 = vpop.f32.mrf.mxu3 }
  0xde   :  { %877 = vmatpush.bf16.xpose.msrb.mxu0 %v1847_v55 }
  0xdf   :  { %904 = vmatpush.bf16.xpose.msra.mxu2 %v1859_v59  ;;  %v679_v59 = vadd.f32 %v678_v11, %v666_v56 }
  0xe2   :  { %888 = vmatpush.bf16.xpose.msra.mxu1 %v1714_v12 }
  0xe6   :  { %878 = vmatpush.bf16.xpose.msrb.mxu0 %v1856_v58 }
  0xe7   :  { %905 = vmatpush.bf16.xpose.msra.mxu2 %v1875_v32 }
  0xea   :  { %889 = vmatpush.bf16.xpose.msra.mxu1 %v1726_v16 }
  0xee   :  { %879 = vmatpush.bf16.xpose.msrb.mxu0 %v1865_v61 }
  0xf1   :  { %v691_v28 = vpop.f32.mrf.mxu2 }
  0xf2   :  { %v692_v40 = vadd.f32 %v691_v28, %v679_v59  ;;  %890 = vmatpush.bf16.xpose.msra.mxu1 %v1738_v20 }
  0xf4   :  { %v705_v1 = vadd.f32 %v704_v29, %v692_v40 }
  0xf6   :  { %v1968_v32 = vmax.f32 %v705_v1, 0.0 }
  0xf8   :  { %v709_v38 = vpack.c.bf16 %v1968_v32, %v1968_v32  ;;  %vm841_vm5 = vcmp.gt.f32.partialorder %v1968_v32, 0.0 }
  0xf9   :  { %v693_v3 = vpop.f32.mrf.mxu2 }
  0xfa   :  { %786 = vmatmul.bf16.vlgmr.msra.gmra.mxu0 %v709_v38  ;;  %891 = vmatpush.bf16.xpose.msra.mxu1 %v1750_v24 }
  0xfb   :  { %924 = vmatpush.bf16.xpose.msra.mxu0 %v1872_v63 }
 0x102   :  { %892 = vmatpush.bf16.xpose.msra.mxu1 %v1778_v33 }
 0x103   :  { %925 = vmatpush.bf16.xpose.msra.mxu0 %v1896_v27 }
 0x10b   :  { %926 = vmatpush.bf16.xpose.msra.mxu0 %v1904_v30 }
 0x113   :  { %927 = vmatpush.bf16.xpose.msra.mxu0 %v1907_v37 }
 0x11b   :  { %928 = vmatpush.bf16.xpose.msra.mxu0 %v1911_v48 }
 0x123   :  { %929 = vmatpush.bf16.xpose.msra.mxu0 %v1914_v35 }
 0x12b   :  { %930 = vmatpush.bf16.xpose.msra.mxu0 %v1918_v0 }
 0x133   :  { %931 = vmatpush.bf16.xpose.msra.mxu0 %v1921_v62 }
 0x177   :  { %v787_v12 = vpop.f32.mrf.mxu0 }
 0x178   :  { %v788_v16 = vadd.f32 %v1504_v8, %v787_v12 }
 0x17a   :  { %v794_v20 = vsel %vm793_vm0, %v788_v16, -1e+09  ;;  %vm1090_vm0 = vcmask 0  }
 0x17b   :  { %795 = vmax.xlane.f32.xlu0 %v794_v20 }
 0x17f   :  { %v789_v24 = vpop.f32.mrf.mxu0 }
 0x1ee   :  { %v796_v27 = vpop.xlane.xlu0 %795 }
 0x1ef   :  { %v797_v30 = vsub.f32 %v794_v20, %v796_v27 }
 0x1f1   :  { %v798_v33 = vmul.f32 1.442695, %v797_v30 }
 0x1f3   :  { %1505 = vpow2.f32 %v798_v33 }
 0x1f9   :  { %v1506_v43 = vpop.eup %1505 }
 0x1fa   :  { %800 = vadd.xlane.f32.xlu0 %v1506_v43 }
 0x26d   :  { %v801_v47 = vpop.xlane.xlu0 %800 }
 0x26e   :  { %1507 = vrcp.f32 %v801_v47  ;;  %v813_v61 = vand.u32 2147483648, %v801_v47  ;;  %v811_v37 = vand.u32 2147483647, %v801_v47  ;;  %vm807_vm2 = vweird.f32 %v801_v47 }
 0x26f   :  { %1509 = vlog2.f32 %v801_v47 }
 0x270   :  { %v814_v62 = vor.u32 1.1754944e-38, %v813_v61  ;;  %vm812_vm4 = vcmp.eq.f32.partialorder %v811_v37, 8.507059e+37 }
 0x274   :  { %v1508_v48 = vpop.eup %1507 }
 0x275   :  { %v803_v52 = vmul.f32 %v1508_v48, %v801_v47  ;;  %v1510_v58 = vpop.eup %1509  ;;  %vm808_vm1 = vweird.f32 %v1508_v48 }
 0x276   :  { %v818_v0 = vmul.f32 0.6931472, %v1510_v58  ;;  %vm809_vm3 = vmor %vm807_vm2, %vm808_vm1 }
 0x277   :  { %v804_v55 = vsub.f32 1.0, %v803_v52 }
 0x278   :  { %v819_v10 = vsub.f32 %v797_v30, %v818_v0 }
 0x279   :  { %v805_v63 = vmul.f32 %v1508_v48, %v804_v55 }
 0x27b   :  { %v806_v35 = vadd.f32 %v1508_v48, %v805_v63 }
 0x27d   :  { %v810_v6 = vsel %vm809_vm3, %v1508_v48, %v806_v35 }
 0x27e   :  { %v815_v7 = vsel %vm812_vm4, %v814_v62, %v810_v6 }
 0x27f   :  { %v816_v9 = vmul.f32 %v1506_v43, %v815_v7 }
 0x281   :  { %v820_v11 = vmul.f32 %v819_v10, %v816_v9  ;;  %v824_v15 = vsub.f32 0.0, %v816_v9  ;;  %v951_v9 = vshrl.u32 %v791_v4, 7 }
 0x283   :  { %821 = vadd.xlane.f32.xlu1 %v820_v11  ;;  %vm952_vm11 = vcmp.lt.s32.totalorder %v951_v9, 2 }
 0x2f6   :  { %v822_v13 = vpop.xlane.xlu1 %821 }
 0x2f7   :  { %v823_v14 = vsub.f32 0.0, %v822_v13 }
 0x2f9   :  { %v825_v17 = vadd.f32 %v823_v14, %v819_v10 }
 0x2fb   :  { %v826_v18 = vmul.f32 %v825_v17, %v824_v15 }
 0x2fd   :  { %v827_v19 = vpack.c.bf16 %v826_v18, %v826_v18 }
 0x2ff   :  { %836 = vmatmul.bf16.vlgmr.msrb.gmra.mxu1 %v827_v19  ;;  %v1421_v19 = vsel %vm952_vm11, 1.0, %v1624_v22 }
 0x300   :  { %937 = vmatpush.bf16.xpose.msrb.mxu1 %v1788_v36  ;;  %v1420_v36 = vsel %vm841_vm5, 1.0, %v1624_v22 }
 0x308   :  { %938 = vmatpush.bf16.xpose.msrb.mxu1 %v1806_v42 }
 0x310   :  { %939 = vmatpush.bf16.xpose.msrb.mxu1 %v1818_v46 }
 0x318   :  { %940 = vmatpush.bf16.xpose.msrb.mxu1 %v1835_v51 }
 0x320   :  { %941 = vmatpush.bf16.xpose.msrb.mxu1 %v1844_v54 }
 0x328   :  { %942 = vmatpush.bf16.xpose.msrb.mxu1 %v1853_v57 }
 0x330   :  { %943 = vmatpush.bf16.xpose.msrb.mxu1 %v1862_v60 }
 0x338   :  { %944 = vmatpush.bf16.xpose.msrb.mxu1 %v1885_v50 }
 0x37c   :  { %v837_v21 = vpop.f32.mrf.mxu1 }
 0x37d   :  { %v844_v23 = vmul.f32 %v1420_v36, %v837_v21 }
 0x37f   :  { %v845_v42 = vpack.c.bf16 %v844_v23, %v844_v23 }
 0x381   :  { %854 = vmatmul.bf16.vlgmr.msrb.gmra.mxu2 %v845_v42  ;;  %867 = vmatmul.bf16.vlgmr.msra.gmra.mxu3 %v845_v42 }
 0x382   :  { %880 = vmatmul.bf16.vlgmr.msrb.gmra.mxu0 %v845_v42  ;;  %893 = vmatmul.bf16.vlgmr.msra.gmra.mxu1 %v845_v42 }
 0x384   :  { %v839_v46 = vpop.f32.mrf.mxu1 }
 0x391   :  { %906 = vmatmul.bf16.vlgmr.msra.gmra.mxu2 %v845_v42  ;;  %919 = vmatmul.bf16.vlgmr.msrb.gmra.mxu3 %v845_v42 }
 0x392   :  { %932 = vmatmul.bf16.vlgmr.msra.gmra.mxu0 %v845_v42  ;;  %945 = vmatmul.bf16.vlgmr.msrb.gmra.mxu1 %v845_v42 }
 0x3ff   :  { %v2005_v51 = vpop.f32.mrf.mxu0  ;;  %v2007_v54 = vpop.f32.mrf.mxu1 }
 0x400   :  { %v957_v41 = vmul.f32 %v2005_v51, %v2005_v51  ;;  %v958_v53 = vmul.f32 %v2007_v54, %v2007_v54 }
 0x404   :  { %v2009_v57 = vpop.f32.mrf.mxu2  ;;  %v2011_v60 = vpop.f32.mrf.mxu3 }
 0x405   :  { %v955_v26 = vmul.f32 %v2009_v57, %v2009_v57  ;;  %v956_v29 = vmul.f32 %v2011_v60, %v2011_v60 }
 0x407   :  { %v883_v50 = vpop.f32.mrf.mxu0  ;;  %v896_v25 = vpop.f32.mrf.mxu1  ;;  %v963_v39 = vadd.f32 %v956_v29, %v955_v26 }
 0x409   :  { %v964_v49 = vadd.f32 %v963_v39, %v957_v41 }
 0x40b   :  { %v965_v40 = vadd.f32 %v964_v49, %v958_v53  ;;  %v2088_v53 = vld [vmem:[#allocation13_spill] sm:$0xff] }
 0x40c   :  { %v857_v31 = vpop.f32.mrf.mxu2  ;;  %v870_v34 = vpop.f32.mrf.mxu3 }
 0x40f   :  { %v933_v44 = vpop.f32.mrf.mxu0  ;;  %v946_v45 = vpop.f32.mrf.mxu1 }
 0x410   :  { %v961_v5 = vmul.f32 %v933_v44, %v933_v44  ;;  %v962_v12 = vmul.f32 %v946_v45, %v946_v45 }
 0x414   :  { %v907_v56 = vpop.f32.mrf.mxu2  ;;  %v920_v59 = vpop.f32.mrf.mxu3 }
 0x415   :  { %v959_v28 = vmul.f32 %v907_v56, %v907_v56  ;;  %v960_v32 = vmul.f32 %v920_v59, %v920_v59 }
 0x417   :  { %v966_v1 = vadd.f32 %v965_v40, %v959_v28  ;;  %v935_v38 = vpop.f32.mrf.mxu0  ;;  %v948_v3 = vpop.f32.mrf.mxu1  ;;  %v2089_v28 = vld [vmem:[#allocation12_spill] sm:$0xff] }
 0x418   :  { %v2090_v40 = vld [vmem:[#allocation16_spill] sm:$0xff]  ;;  %v2094_v38 = vld [vmem:[#allocation18_spill] sm:$0xff] }
 0x419   :  { %v967_v8 = vadd.f32 %v966_v1, %v960_v32  ;;  %v2091_v1 = vld [vmem:[#allocation14_spill] sm:$0xff] }
 0x41b   :  { %v968_v16 = vadd.f32 %v967_v8, %v961_v5 }
 0x41c   :  { %v909_v20 = vpop.f32.mrf.mxu2  ;;  %v922_v24 = vpop.f32.mrf.mxu3 }
 0x41d   :  { %v969_v27 = vadd.f32 %v968_v16, %v962_v12  ;;  %v1048_v20 = vld [vmem:[#allocation2] sm:$0xff] }
 0x41f   :  { %970 = vadd.xlane.f32.xlu1 %v969_v27 }
 0x492   :  { %v971_v30 = vpop.xlane.xlu1 %970 }
 0x493   :  { %1511 = vrsqrt.f32 %v971_v30  ;;  %vm979_vm6 = vcmp.eq.f32.partialorder %v971_v30, inf  ;;  %v982_v61 = vand.u32 2147483648, %v971_v30  ;;  %vm981_vm7 = vcmp.eq.f32.partialorder %v971_v30, 0.0 }
 0x499   :  { %v1512_v33 = vpop.eup %1511 }
 0x49a   :  { %v973_v43 = vmul.f32 %v1512_v33, %v971_v30 }
 0x49c   :  { %v974_v47 = vmul.f32 %v1512_v33, %v973_v43  ;;  %v1049_v43 = vld [vmem:[#allocation2 + $0x8] sm:$0xff] }
 0x49e   :  { %v975_v48 = vmul.f32 0.5, %v974_v47  ;;  %v1050_v47 = vld [vmem:[#allocation2 + $0x10] sm:$0xff] }
 0x4a0   :  { %v976_v52 = vsub.f32 1.5, %v975_v48 }
 0x4a2   :  { %v977_v55 = vmul.f32 %v1512_v33, %v976_v52 }
 0x4a4   :  { %v978_v58 = vmul.f32 %v977_v55, %v971_v30 }
 0x4a6   :  { %v980_v63 = vsel %vm979_vm6, %v971_v30, %v978_v58 }
 0x4a7   :  { %v983_v37 = vsel %vm981_vm7, %v982_v61, %v980_v63  ;;  %v1051_v63 = vld [vmem:[#allocation2 + $0x18] sm:$0xff] }
 0x4a8   :  { %v984_v35 = vmax.f32 %v983_v37, 1e-12 }
 0x4aa   :  { %1513 = vrcp.f32 %v984_v35  ;;  %v996_v7 = vand.u32 2147483648, %v984_v35  ;;  %v994_v11 = vand.u32 2147483647, %v984_v35  ;;  %vm990_vm9 = vweird.f32 %v984_v35 }
 0x4ac   :  { %v997_v14 = vor.u32 1.1754944e-38, %v996_v7  ;;  %vm995_vm12 = vcmp.eq.f32.partialorder %v994_v11, 8.507059e+37 }
 0x4b0   :  { %v1514_v0 = vpop.eup %1513 }
 0x4b1   :  { %v986_v62 = vmul.f32 %v1514_v0, %v984_v35  ;;  %vm991_vm8 = vweird.f32 %v1514_v0 }
 0x4b2   :  { %vm992_vm10 = vmor %vm990_vm9, %vm991_vm8 }
 0x4b3   :  { %v987_v6 = vsub.f32 1.0, %v986_v62 }
 0x4b5   :  { %v988_v10 = vmul.f32 %v1514_v0, %v987_v6  ;;  %v1052_v6 = vld [vmem:[#allocation2 + $0x20] sm:$0xff] }
 0x4b7   :  { %v989_v13 = vadd.f32 %v1514_v0, %v988_v10 }
 0x4b9   :  { %v993_v15 = vsel %vm992_vm10, %v1514_v0, %v989_v13  ;;  %v1053_v13 = vld [vmem:[#allocation2 + $0x28] sm:$0xff] }
 0x4ba   :  { %v998_v17 = vsel %vm995_vm12, %v997_v14, %v993_v15 }
 0x4bb   :  { %v999_v18 = vmul.f32 0.16666667, %v998_v17 }
 0x4bd   :  { %v1000_v21 = vmul.f32 %v999_v18, %v2009_v57  ;;  %v1001_v36 = vmul.f32 %v999_v18, %v2011_v60  ;;  %v1002_v4 = vmul.f32 %v999_v18, %v2005_v51  ;;  %v1003_v23 = vmul.f32 %v999_v18, %v2007_v54 }
 0x4be   :  { %v1004_v42 = vmul.f32 %v999_v18, %v907_v56  ;;  %v1005_v46 = vmul.f32 %v999_v18, %v920_v59  ;;  %v1006_v50 = vmul.f32 %v999_v18, %v933_v44  ;;  %v1007_v25 = vmul.f32 %v999_v18, %v946_v45  ;;  %v2092_v56 = vld [vmem:[#allocation17_spill] sm:$0xff]  ;;  %v2093_v44 = vld [vmem:[#allocation15_spill] sm:$0xff] }
 0x4bf   :  { %v1008_v26 = vmul.f32 %v1421_v19, %v1000_v21  ;;  %v1009_v29 = vmul.f32 %v1421_v19, %v1001_v36  ;;  %v1010_v31 = vmul.f32 %v1421_v19, %v1002_v4  ;;  %v1011_v34 = vmul.f32 %v1421_v19, %v1003_v23  ;;  %v1054_v18 = vld [vmem:[#allocation2 + $0x30] sm:$0xff]  ;;  %v1055_v4 = vld [vmem:[#allocation2 + $0x38] sm:$0xff] }
 0x4c0   :  { %v1012_v39 = vmul.f32 %v1421_v19, %v1004_v42  ;;  %v1013_v41 = vmul.f32 %v1421_v19, %v1005_v46  ;;  %v1014_v49 = vmul.f32 %v1421_v19, %v1006_v50  ;;  %v1015_v22 = vmul.f32 %v1421_v19, %v1007_v25 }
 0x4c1   :  { %v1016_v57 = vadd.f32 %v1008_v26, %v2088_v53  ;;  %v1017_v60 = vadd.f32 %v1009_v29, %v2089_v28  ;;  %v1018_v51 = vadd.f32 %v1010_v31, %v2090_v40  ;;  %v1019_v54 = vadd.f32 %v1011_v34, %v2091_v1 }
 0x4c2   :  { %v1020_v59 = vadd.f32 %v1012_v39, %v2092_v56  ;;  %v1021_v45 = vadd.f32 %v1013_v41, %v2093_v44  ;;  %v1022_v32 = vadd.f32 %v1014_v49, %v1926_v2  ;;  %v1023_v3 = vadd.f32 %v1015_v22, %v2094_v38 }
 0x4c3   :  { %v1024_v5 = vmax.f32 %v1016_v57, 0.0  ;;  %v1025_v8 = vmax.f32 %v1017_v60, 0.0  ;;  %v1026_v12 = vmax.f32 %v1018_v51, 0.0  ;;  %v1027_v16 = vmax.f32 %v1019_v54, 0.0 }
 0x4c4   :  { %v1028_v24 = vmax.f32 %v1020_v59, 0.0  ;;  %v1029_v27 = vmax.f32 %v1021_v45, 0.0  ;;  %v1030_v30 = vmax.f32 %v1022_v32, 0.0  ;;  %v1031_v33 = vmax.f32 %v1023_v3, 0.0 }
 0x4c5   :  { %v1032_v48 = vmin.f32 %v1024_v5, 1.0  ;;  %v1033_v52 = vmin.f32 %v1025_v8, 1.0  ;;  %v1034_v55 = vmin.f32 %v1026_v12, 1.0  ;;  %v1035_v58 = vmin.f32 %v1027_v16, 1.0 }
 0x4c6   :  { %v1036_v61 = vmin.f32 %v1028_v24, 1.0  ;;  %v1037_v2 = vmin.f32 %v1029_v27, 1.0  ;;  %v1038_v62 = vmin.f32 %v1030_v30, 1.0  ;;  %v1039_v7 = vmin.f32 %v1031_v33, 1.0 }
 0x4c7   :  { %1041 = vst [vmem:[%s2071_s6 + $0x8] sm:$0xff] %v1033_v52  ;;  %v1056_v37 = vsub.f32 %v1032_v48, %v1048_v20  ;;  %v1057_v35 = vsub.f32 %v1033_v52, %v1049_v43  ;;  %v1058_v0 = vsub.f32 %v1034_v55, %v1050_v47  ;;  %v1059_v9 = vsub.f32 %v1035_v58, %v1051_v63 }
 0x4c8   :  { %1042 = vst [vmem:[%s2071_s6 + $0x10] sm:$0xff] %v1034_v55  ;;  %v1060_v14 = vsub.f32 %v1036_v61, %v1052_v6  ;;  %v1061_v19 = vsub.f32 %v1037_v2, %v1053_v13  ;;  %v1062_v23 = vsub.f32 %v1038_v62, %v1054_v18  ;;  %v1063_v50 = vsub.f32 %v1039_v7, %v1055_v4 }
 0x4c9   :  { %1043 = vst [vmem:[%s2071_s6 + $0x18] sm:$0xff] %v1035_v58  ;;  %v1064_v10 = vmul.f32 %v1056_v37, %v1056_v37  ;;  %v1065_v11 = vmul.f32 %v1057_v35, %v1057_v35  ;;  %v1066_v15 = vmul.f32 %v1058_v0, %v1058_v0  ;;  %v1067_v21 = vmul.f32 %v1059_v9, %v1059_v9 }
 0x4ca   :  { %1044 = vst [vmem:[%s2071_s6 + $0x20] sm:$0xff] %v1036_v61  ;;  %v1068_v42 = vmul.f32 %v1060_v14, %v1060_v14  ;;  %v1069_v25 = vmul.f32 %v1061_v19, %v1061_v19  ;;  %v1070_v29 = vmul.f32 %v1062_v23, %v1062_v23  ;;  %v1071_v34 = vmul.f32 %v1063_v50, %v1063_v50 }
 0x4cb   :  { %1045 = vst [vmem:[%s2071_s6 + $0x28] sm:$0xff] %v1037_v2  ;;  %v1072_v17 = vadd.f32 %v1065_v11, %v1064_v10 }
 0x4cc   :  { %1046 = vst [vmem:[%s2071_s6 + $0x30] sm:$0xff] %v1038_v62 }
 0x4cd   :  { %1047 = vst [vmem:[%s2071_s6 + $0x38] sm:$0xff] %v1039_v7  ;;  %v1073_v36 = vadd.f32 %v1072_v17, %v1066_v15 }
 0x4ce   :  { %1040 = vst [vmem:[%s2071_s6] sm:$0xff] %v1032_v48 }
 0x4cf   :  { %v1074_v46 = vadd.f32 %v1073_v36, %v1067_v21 }
 0x4d1   :  { %v1075_v26 = vadd.f32 %v1074_v46, %v1068_v42 }
 0x4d3   :  { %v1076_v31 = vadd.f32 %v1075_v26, %v1069_v25 }
 0x4d5   :  { %v1077_v39 = vadd.f32 %v1076_v31, %v1070_v29 }
 0x4d7   :  { %v1078_v41 = vadd.f32 %v1077_v39, %v1071_v34 }
 0x4d9   :  { %1079 = vadd.xlane.f32.xlu2 %v1078_v41 }
 0x54c   :  { %v1080_v49 = vpop.xlane.xlu2 %1079 }
 0x54d   :  { %1515 = vrsqrt.f32 %v1080_v49  ;;  %v1081_v22 = vrot.slane %v1080_v49, 4  ;;  %vm1099_vm14 = vcmp.eq.f32.partialorder %v1080_v49, inf  ;;  %v1102_v32 = vand.u32 2147483648, %v1080_v49 }
 0x54e   :  { %vm1101_vm15 = vcmp.eq.f32.partialorder %v1080_v49, 0.0 }
 0x54f   :  { %v1082_v53 = vadd.f32 %v1081_v22, %v1080_v49 }
 0x551   :  { %v1083_v57 = vrot.slane %v1082_v53, 2 }
 0x553   :  { %v1516_v28 = vpop.eup %1515  ;;  %v1084_v40 = vadd.f32 %v1083_v57, %v1082_v53 }
 0x554   :  { %v1093_v60 = vmul.f32 %v1516_v28, %v1080_v49 }
 0x555   :  { %v1085_v1 = vrot.slane %v1084_v40, 1 }
 0x556   :  { %v1094_v51 = vmul.f32 %v1516_v28, %v1093_v60 }
 0x557   :  { %v1086_v56 = vadd.f32 %v1085_v1, %v1084_v40 }
 0x558   :  { %v1095_v54 = vmul.f32 0.5, %v1094_v51 }
 0x559   :  { %1494 = vpush %v1086_v56 }
 0x55a   :  { %v1096_v59 = vsub.f32 1.5, %v1095_v54 }
 0x55c   :  { %v1097_v44 = vmul.f32 %v1516_v28, %v1096_v59 }
 0x55e   :  { %v1098_v45 = vmul.f32 %v1097_v44, %v1080_v49 }
 0x560   :  { %v1100_v38 = vsel %vm1099_vm14, %v1080_v49, %v1098_v45 }
 0x561   :  { %v1103_v3 = vsel %vm1101_vm15, %v1102_v32, %v1100_v38 }
 0x562   :  { %1105 = vst.msk [vmem:[%s2073_s8] sm:$0xff] %vm1104_vm13, %v1103_v3 }
 0x58a   :  { %s1495_s11 = spop %1494 }
 0x58b   :  { %s1088_s12 = smul.f32 0.00048828125, %s1495_s11 }
 0x58d   :  { %v1089_v5 = vstv %s1088_s12 }
 0x58e   :  { %1091 = vst.msk [vmem:[#allocation8] sm:$0x1] %vm1090_vm0, %v1089_v5 }
 0x58f   :  { %1118 = dma.vmem_to_hbm [thread:$0]  %s1114_s29, 16, %s1116_s10, [#allocation4]  }
 0x590   :  { %1617 = dma.done.wait [#allocation4], 16  }
 0x591   :  { %1618 = vsyncadd [#allocation4], 4294967280 }
 0x592   :  { %1129 = vsyncpa [#allocation3], 1 }
 0x593   :  { %1130 = vsyncpa [#allocation6], 1 }
 0x594   :  { %1131 = vsyncpa [#allocation4], 1 }

</bundles_post_ra>
